<compile_context>
chip_gen: v7x
topology: tpu7x:2x2x1
jax: 0.10.0
libtpu: 0.0.40
codegen_flags: <defaults>
</compile_context>

<pallas_src>
import jax
import jax.numpy as jnp
from jax.experimental import pallas as pl
from jax.experimental.pallas import tpu as pltpu

EPS = 1e-5
C = 232                 # real channel count
CP = 256                # lane-dense padded channel count
H = W = 14              # input spatial size
HO = WO = 7             # output spatial size of the stride-2 conv
N_REAL = H * W          # 196 real positions for BN statistics
C_HALF = 128            # output-channel block per grid step (2 steps)


def fused_kernel(x_ref, w1_ref, gamma_ref, beta_ref, mask_ref, wdw_ref, o_ref):
    # x:     (256, 256)  de-interleaved, spatially padded, channels-last input
    # w1:    (256, 128)  1x1-conv weight slab (Cin_pad, Cout_half)
    # gamma/beta: (1, 128)
    # mask:  (256, 1)    1.0 at real spatial positions, 0.0 at pad positions
    # wdw:   (9, 128)    depthwise 3x3 taps, row = kh*3 + kw
    # o:     (64, 128)   flattened 8x8 output grid (valid region is 7x7)
    x = x_ref[...]
    w = w1_ref[...]
    y = jnp.dot(x, w, preferred_element_type=jnp.float32)        # 1x1 conv (MXU)

    # Training-mode BatchNorm: batch stats over the 196 real positions only.
    # Pad rows of x are all-zero => their y rows are zero => sums are unaffected.
    inv_n = 1.0 / N_REAL
    s1 = jnp.sum(y, axis=0, keepdims=True)
    s2 = jnp.sum(y * y, axis=0, keepdims=True)
    mean = s1 * inv_n
    var = s2 * inv_n - mean * mean                               # biased variance
    y = (y - mean) * jax.lax.rsqrt(var + EPS)
    y = y * gamma_ref[...] + beta_ref[...]
    y = jnp.maximum(y, 0.0) * mask_ref[...]                      # ReLU + re-zero pad

    # Depthwise 3x3 stride-2 over the padded slab.
    # Parity plane p = 2*(row%2) + (col%2); plane element (r,c) <-> padded (2r+p_r, 2c+p_c).
    # Tap (kh,kw) at output (i,j) = plane[kh%2*2 + kw%2][i + kh//2, j + kw//2],
    # i.e. the plane flat-shifted by 8*(kh//2) + (kw//2) rows.  Rows with i==7 or
    # j==7 are garbage and are dropped by the wrapper.
    wdw = wdw_ref[...]
    nc = y.shape[1]
    acc = jnp.zeros((64, nc), jnp.float32)
    for kh in range(3):
        for kw in range(3):
            p = 2 * (kh % 2) + (kw % 2)
            plane = y[64 * p:64 * (p + 1), :]                    # (64, 128) static slice
            shift = 8 * (kh // 2) + (kw // 2)
            if shift:
                tap = jnp.concatenate(
                    [plane[shift:, :], jnp.zeros((shift, nc), jnp.float32)], axis=0)
            else:
                tap = plane
            k = kh * 3 + kw
            acc = acc + tap * wdw[k:k + 1, :]
    o_ref[...] = acc


def _deinterleave(img):
    # (16, 16, K) -> (256, K): flat index = 64*(2*(row%2) + (col%2)) + 8*(row//2) + (col//2)
    k = img.shape[-1]
    return img.reshape(8, 2, 8, 2, k).transpose(1, 3, 0, 2, 4).reshape(256, k)


@jax.jit
def module_forward(x_nchw, w1, gamma, beta, w_dw):
    n, c, h, w = x_nchw.shape
    assert (n, c, h, w) == (1, C, H, W)

    # ---- glue: layout, channel/spatial padding, de-interleave (pure XLA) ----
    xi = jnp.transpose(x_nchw[0], (1, 2, 0))                      # (14,14,232)
    xi = jnp.pad(xi, ((1, 1), (1, 1), (0, CP - C)))               # (16,16,256)
    x_flat = _deinterleave(xi)                                    # (256,256)

    w1_p = jnp.zeros((CP, CP), jnp.float32).at[:C, :C].set(w1.reshape(C, C).T)
    gamma_p = jnp.zeros((1, CP), jnp.float32).at[0, :C].set(gamma)
    beta_p = jnp.zeros((1, CP), jnp.float32).at[0, :C].set(beta)
    wdw_p = jnp.zeros((9, CP), jnp.float32).at[:, :C].set(w_dw.reshape(C, 9).T)

    mask = jnp.pad(jnp.ones((H, W, 1), jnp.float32), ((1, 1), (1, 1), (0, 0)))
    mask = _deinterleave(mask)                                    # (256,1)

    cost = pl.CostEstimate(
        flops=2 * 256 * CP * CP + 2 * 9 * 64 * CP,
        transcendentals=CP,
        bytes_accessed=4 * (256 * CP + CP * CP + 64 * CP + 9 * CP + 256 + 2 * CP))

    out_flat = pl.pallas_call(
        fused_kernel,
        out_shape=jax.ShapeDtypeStruct((64, CP), jnp.float32),
        grid=(CP // C_HALF,),
        in_specs=[
            pl.BlockSpec((256, CP), lambda j: (0, 0)),
            pl.BlockSpec((CP, C_HALF), lambda j: (0, j)),
            pl.BlockSpec((1, C_HALF), lambda j: (0, j)),
            pl.BlockSpec((1, C_HALF), lambda j: (0, j)),
            pl.BlockSpec((256, 1), lambda j: (0, 0)),
            pl.BlockSpec((9, C_HALF), lambda j: (0, j)),
        ],
        out_specs=pl.BlockSpec((64, C_HALF), lambda j: (0, j)),
        compiler_params=pltpu.CompilerParams(dimension_semantics=("parallel",)),
        cost_estimate=cost,
    )(x_flat, w1_p, gamma_p, beta_p, mask, wdw_p)

    # glue: drop the garbage 8th row/col, drop padded channels, back to NCHW
    out = out_flat.reshape(8, 8, CP)[:HO, :WO, :C]
    return jnp.transpose(out, (2, 0, 1))[None]                    # (1,232,7,7)


def make_params(key, c=C):
    k1, k2 = jax.random.split(key)
    w1 = jax.random.normal(k1, (c, c, 1, 1), jnp.float32) / jnp.sqrt(float(c))
    gamma = jnp.ones((c,), jnp.float32)   # BatchNorm2d default affine init
    beta = jnp.zeros((c,), jnp.float32)
    w_dw = jax.random.normal(k2, (c, 1, 3, 3), jnp.float32) / 3.0
    return w1, gamma, beta, w_dw


def reference_forward(x, w1, gamma, beta, w_dw):
    c = x.shape[1]
    y = jax.lax.conv_general_dilated(
        x, w1, (1, 1), "VALID", dimension_numbers=("NCHW", "OIHW", "NCHW"))
    mean = jnp.mean(y, axis=(0, 2, 3), keepdims=True)
    var = jnp.mean((y - mean) ** 2, axis=(0, 2, 3), keepdims=True)
    y = (y - mean) * jax.lax.rsqrt(var + EPS)
    y = y * gamma.reshape(1, -1, 1, 1) + beta.reshape(1, -1, 1, 1)
    y = jnp.maximum(y, 0.0)
    out = jax.lax.conv_general_dilated(
        y, w_dw, (2, 2), ((1, 1), (1, 1)),
        dimension_numbers=("NCHW", "OIHW", "NCHW"), feature_group_count=c)
    return out


if __name__ == "__main__":
    key = jax.random.PRNGKey(0)
    kx, kp = jax.random.split(key)

    # shape implied by the module's forward: x272 ~ (1, 232, 14, 14)
    x = jax.random.normal(kx, (1, C, H, W), jnp.float32)
    w1, gamma, beta, w_dw = make_params(kp)

    out = jax.block_until_ready(module_forward(x, w1, gamma, beta, w_dw))
    assert out.shape == (1, C, HO, WO), out.shape

    ref = reference_forward(x, w1, gamma, beta, w_dw)
    err = float(jnp.max(jnp.abs(out - ref)))
    if err > 2e-3:
        raise AssertionError(f"mismatch vs reference, max abs err = {err}")
    print("KERNEL_OK")
</pallas_src>

<mosaic_0001>
module attributes {stable_mosaic.version = 11 : i64} {
  func.func @fused_kernel(%arg0: i32, %arg1: memref<256x256xf32, #tpu.memory_space<vmem>>, %arg2: memref<256x128xf32, #tpu.memory_space<vmem>>, %arg3: memref<1x128xf32, #tpu.memory_space<vmem>>, %arg4: memref<1x128xf32, #tpu.memory_space<vmem>>, %arg5: memref<256x1xf32, #tpu.memory_space<vmem>>, %arg6: memref<9x128xf32, #tpu.memory_space<vmem>>, %arg7: memref<64x128xf32, #tpu.memory_space<vmem>>) attributes {dimension_semantics = [#tpu.dimension_semantics<parallel>], iteration_bounds = array<i64: 2>, scalar_prefetch = 0 : i64, scratch_operands = 0 : i64, tpu.core_type = #tpu.core_type<tc>, window_params = [{pipeline_mode = #tpu.pipeline_mode<synchronous>, transform_indices = @transform_0, window_bounds = array<i64: 256, 256>}, {transform_indices = @transform_1, window_bounds = array<i64: 256, 128>}, {transform_indices = @transform_2, window_bounds = array<i64: 1, 128>}, {transform_indices = @transform_3, window_bounds = array<i64: 1, 128>}, {pipeline_mode = #tpu.pipeline_mode<synchronous>, transform_indices = @transform_4, window_bounds = array<i64: 256, 1>}, {transform_indices = @transform_5, window_bounds = array<i64: 9, 128>}, {transform_indices = @transform_6, window_bounds = array<i64: 64, 128>}]} {
    %c0 = arith.constant 0 : index
    %c0_0 = arith.constant 0 : index
    %0 = vector.load %arg1[%c0, %c0_0] : memref<256x256xf32, #tpu.memory_space<vmem>>, vector<256x256xf32>
    %c0_1 = arith.constant 0 : index
    %c0_2 = arith.constant 0 : index
    %1 = vector.load %arg2[%c0_1, %c0_2] : memref<256x128xf32, #tpu.memory_space<vmem>>, vector<256x128xf32>
    %cst = arith.constant dense<0.000000e+00> : vector<256x128xf32>
    %2 = tpu.matmul %0, %1, %cst {dimension_numbers = #tpu.dot_dimension_numbers<[1], [0], [0], [1], [0, 0, 1, 1], [], []>} : vector<256x256xf32>, vector<256x128xf32>, vector<256x128xf32> -> vector<256x128xf32>
    %cst_3 = arith.constant dense<0.000000e+00> : vector<128xf32>
    %3 = vector.multi_reduction <add>, %2, %cst_3 [0] : vector<256x128xf32> to vector<128xf32>
    %4 = vector.shape_cast %3 : vector<128xf32> to vector<1x128xf32>
    %5 = arith.mulf %2, %2 : vector<256x128xf32>
    %cst_4 = arith.constant dense<0.000000e+00> : vector<128xf32>
    %6 = vector.multi_reduction <add>, %5, %cst_4 [0] : vector<256x128xf32> to vector<128xf32>
    %7 = vector.shape_cast %6 : vector<128xf32> to vector<1x128xf32>
    %cst_5 = arith.constant 0.00510204071 : f32
    %8 = vector.broadcast %cst_5 : f32 to vector<1x128xf32>
    %9 = arith.mulf %4, %8 : vector<1x128xf32>
    %cst_6 = arith.constant 0.00510204071 : f32
    %10 = vector.broadcast %cst_6 : f32 to vector<1x128xf32>
    %11 = arith.mulf %7, %10 : vector<1x128xf32>
    %12 = arith.mulf %9, %9 : vector<1x128xf32>
    %13 = arith.subf %11, %12 : vector<1x128xf32>
    %14 = vector.broadcast %9 : vector<1x128xf32> to vector<256x128xf32>
    %15 = arith.subf %2, %14 : vector<256x128xf32>
    %cst_7 = arith.constant 9.99999974E-6 : f32
    %16 = vector.broadcast %cst_7 : f32 to vector<1x128xf32>
    %17 = arith.addf %13, %16 : vector<1x128xf32>
    %18 = math.rsqrt %17 : vector<1x128xf32>
    %19 = vector.broadcast %18 : vector<1x128xf32> to vector<256x128xf32>
    %20 = arith.mulf %15, %19 : vector<256x128xf32>
    %c0_8 = arith.constant 0 : index
    %c0_9 = arith.constant 0 : index
    %21 = vector.load %arg3[%c0_8, %c0_9] : memref<1x128xf32, #tpu.memory_space<vmem>>, vector<1x128xf32>
    %22 = vector.broadcast %21 : vector<1x128xf32> to vector<256x128xf32>
    %23 = arith.mulf %20, %22 : vector<256x128xf32>
    %c0_10 = arith.constant 0 : index
    %c0_11 = arith.constant 0 : index
    %24 = vector.load %arg4[%c0_10, %c0_11] : memref<1x128xf32, #tpu.memory_space<vmem>>, vector<1x128xf32>
    %25 = vector.broadcast %24 : vector<1x128xf32> to vector<256x128xf32>
    %26 = arith.addf %23, %25 : vector<256x128xf32>
    %cst_12 = arith.constant 0.000000e+00 : f32
    %27 = vector.broadcast %cst_12 : f32 to vector<256x128xf32>
    %28 = arith.maximumf %26, %27 : vector<256x128xf32>
    %c0_13 = arith.constant 0 : index
    %c0_14 = arith.constant 0 : index
    %29 = vector.load %arg5[%c0_13, %c0_14] : memref<256x1xf32, #tpu.memory_space<vmem>>, vector<256x1xf32>
    %30 = vector.broadcast %29 : vector<256x1xf32> to vector<256x128xf32>
    %31 = arith.mulf %28, %30 : vector<256x128xf32>
    %c0_15 = arith.constant 0 : index
    %c0_16 = arith.constant 0 : index
    %32 = vector.load %arg6[%c0_15, %c0_16] : memref<9x128xf32, #tpu.memory_space<vmem>>, vector<9x128xf32>
    %cst_17 = arith.constant 0.000000e+00 : f32
    %33 = vector.broadcast %cst_17 : f32 to vector<64x128xf32>
    %34 = vector.extract_strided_slice %31 {offsets = [0, 0], sizes = [64, 128], strides = [1, 1]} : vector<256x128xf32> to vector<64x128xf32>
    %35 = vector.extract_strided_slice %32 {offsets = [0, 0], sizes = [1, 128], strides = [1, 1]} : vector<9x128xf32> to vector<1x128xf32>
    %36 = vector.broadcast %35 : vector<1x128xf32> to vector<64x128xf32>
    %37 = arith.mulf %34, %36 : vector<64x128xf32>
    %38 = arith.addf %33, %37 : vector<64x128xf32>
    %39 = vector.extract_strided_slice %31 {offsets = [64, 0], sizes = [64, 128], strides = [1, 1]} : vector<256x128xf32> to vector<64x128xf32>
    %40 = vector.extract_strided_slice %32 {offsets = [1, 0], sizes = [1, 128], strides = [1, 1]} : vector<9x128xf32> to vector<1x128xf32>
    %41 = vector.broadcast %40 : vector<1x128xf32> to vector<64x128xf32>
    %42 = arith.mulf %39, %41 : vector<64x128xf32>
    %43 = arith.addf %38, %42 : vector<64x128xf32>
    %44 = vector.extract_strided_slice %31 {offsets = [0, 0], sizes = [64, 128], strides = [1, 1]} : vector<256x128xf32> to vector<64x128xf32>
    %45 = vector.extract_strided_slice %44 {offsets = [1, 0], sizes = [63, 128], strides = [1, 1]} : vector<64x128xf32> to vector<63x128xf32>
    %cst_18 = arith.constant 0.000000e+00 : f32
    %46 = vector.broadcast %cst_18 : f32 to vector<1x128xf32>
    %47 = tpu.concatenate %45, %46 in 0 : vector<63x128xf32>, vector<1x128xf32> -> vector<64x128xf32>
    %48 = vector.extract_strided_slice %32 {offsets = [2, 0], sizes = [1, 128], strides = [1, 1]} : vector<9x128xf32> to vector<1x128xf32>
    %49 = vector.broadcast %48 : vector<1x128xf32> to vector<64x128xf32>
    %50 = arith.mulf %47, %49 : vector<64x128xf32>
    %51 = arith.addf %43, %50 : vector<64x128xf32>
    %52 = vector.extract_strided_slice %31 {offsets = [128, 0], sizes = [64, 128], strides = [1, 1]} : vector<256x128xf32> to vector<64x128xf32>
    %53 = vector.extract_strided_slice %32 {offsets = [3, 0], sizes = [1, 128], strides = [1, 1]} : vector<9x128xf32> to vector<1x128xf32>
    %54 = vector.broadcast %53 : vector<1x128xf32> to vector<64x128xf32>
    %55 = arith.mulf %52, %54 : vector<64x128xf32>
    %56 = arith.addf %51, %55 : vector<64x128xf32>
    %57 = vector.extract_strided_slice %31 {offsets = [192, 0], sizes = [64, 128], strides = [1, 1]} : vector<256x128xf32> to vector<64x128xf32>
    %58 = vector.extract_strided_slice %32 {offsets = [4, 0], sizes = [1, 128], strides = [1, 1]} : vector<9x128xf32> to vector<1x128xf32>
    %59 = vector.broadcast %58 : vector<1x128xf32> to vector<64x128xf32>
    %60 = arith.mulf %57, %59 : vector<64x128xf32>
    %61 = arith.addf %56, %60 : vector<64x128xf32>
    %62 = vector.extract_strided_slice %31 {offsets = [128, 0], sizes = [64, 128], strides = [1, 1]} : vector<256x128xf32> to vector<64x128xf32>
    %63 = vector.extract_strided_slice %62 {offsets = [1, 0], sizes = [63, 128], strides = [1, 1]} : vector<64x128xf32> to vector<63x128xf32>
    %cst_19 = arith.constant 0.000000e+00 : f32
    %64 = vector.broadcast %cst_19 : f32 to vector<1x128xf32>
    %65 = tpu.concatenate %63, %64 in 0 : vector<63x128xf32>, vector<1x128xf32> -> vector<64x128xf32>
    %66 = vector.extract_strided_slice %32 {offsets = [5, 0], sizes = [1, 128], strides = [1, 1]} : vector<9x128xf32> to vector<1x128xf32>
    %67 = vector.broadcast %66 : vector<1x128xf32> to vector<64x128xf32>
    %68 = arith.mulf %65, %67 : vector<64x128xf32>
    %69 = arith.addf %61, %68 : vector<64x128xf32>
    %70 = vector.extract_strided_slice %31 {offsets = [0, 0], sizes = [64, 128], strides = [1, 1]} : vector<256x128xf32> to vector<64x128xf32>
    %71 = vector.extract_strided_slice %70 {offsets = [8, 0], sizes = [56, 128], strides = [1, 1]} : vector<64x128xf32> to vector<56x128xf32>
    %cst_20 = arith.constant 0.000000e+00 : f32
    %72 = vector.broadcast %cst_20 : f32 to vector<8x128xf32>
    %73 = tpu.concatenate %71, %72 in 0 : vector<56x128xf32>, vector<8x128xf32> -> vector<64x128xf32>
    %74 = vector.extract_strided_slice %32 {offsets = [6, 0], sizes = [1, 128], strides = [1, 1]} : vector<9x128xf32> to vector<1x128xf32>
    %75 = vector.broadcast %74 : vector<1x128xf32> to vector<64x128xf32>
    %76 = arith.mulf %73, %75 : vector<64x128xf32>
    %77 = arith.addf %69, %76 : vector<64x128xf32>
    %78 = vector.extract_strided_slice %31 {offsets = [64, 0], sizes = [64, 128], strides = [1, 1]} : vector<256x128xf32> to vector<64x128xf32>
    %79 = vector.extract_strided_slice %78 {offsets = [8, 0], sizes = [56, 128], strides = [1, 1]} : vector<64x128xf32> to vector<56x128xf32>
    %cst_21 = arith.constant 0.000000e+00 : f32
    %80 = vector.broadcast %cst_21 : f32 to vector<8x128xf32>
    %81 = tpu.concatenate %79, %80 in 0 : vector<56x128xf32>, vector<8x128xf32> -> vector<64x128xf32>
    %82 = vector.extract_strided_slice %32 {offsets = [7, 0], sizes = [1, 128], strides = [1, 1]} : vector<9x128xf32> to vector<1x128xf32>
    %83 = vector.broadcast %82 : vector<1x128xf32> to vector<64x128xf32>
    %84 = arith.mulf %81, %83 : vector<64x128xf32>
    %85 = arith.addf %77, %84 : vector<64x128xf32>
    %86 = vector.extract_strided_slice %31 {offsets = [0, 0], sizes = [64, 128], strides = [1, 1]} : vector<256x128xf32> to vector<64x128xf32>
    %87 = vector.extract_strided_slice %86 {offsets = [9, 0], sizes = [55, 128], strides = [1, 1]} : vector<64x128xf32> to vector<55x128xf32>
    %cst_22 = arith.constant 0.000000e+00 : f32
    %88 = vector.broadcast %cst_22 : f32 to vector<9x128xf32>
    %89 = tpu.concatenate %87, %88 in 0 : vector<55x128xf32>, vector<9x128xf32> -> vector<64x128xf32>
    %90 = vector.extract_strided_slice %32 {offsets = [8, 0], sizes = [1, 128], strides = [1, 1]} : vector<9x128xf32> to vector<1x128xf32>
    %91 = vector.broadcast %90 : vector<1x128xf32> to vector<64x128xf32>
    %92 = arith.mulf %89, %91 : vector<64x128xf32>
    %93 = arith.addf %85, %92 : vector<64x128xf32>
    %c0_23 = arith.constant 0 : index
    %c0_24 = arith.constant 0 : index
    %94 = vector.load %arg7[%c0_23, %c0_24] : memref<64x128xf32, #tpu.memory_space<vmem>>, vector<64x128xf32>
    tpu.vector_store %arg7[%c0_23, %c0_24], %93 {strides = array<i32>} : memref<64x128xf32, #tpu.memory_space<vmem>>, vector<64x128xf32>,
    return
  }
  func.func @transform_0(%arg0: i32) -> (i32, i32) {
    %c0_i32 = arith.constant 0 : i32
    %c0_i32_0 = arith.constant 0 : i32
    %c0_i32_1 = arith.constant 0 : i32
    return %c0_i32, %c0_i32_0 : i32, i32
  }
  func.func @transform_1(%arg0: i32) -> (i32, i32) {
    %c0_i32 = arith.constant 0 : i32
    %c0_i32_0 = arith.constant 0 : i32
    return %c0_i32, %arg0 : i32, i32
  }
  func.func @transform_2(%arg0: i32) -> (i32, i32) {
    %c0_i32 = arith.constant 0 : i32
    %c0_i32_0 = arith.constant 0 : i32
    return %c0_i32, %arg0 : i32, i32
  }
  func.func @transform_3(%arg0: i32) -> (i32, i32) {
    %c0_i32 = arith.constant 0 : i32
    %c0_i32_0 = arith.constant 0 : i32
    return %c0_i32, %arg0 : i32, i32
  }
  func.func @transform_4(%arg0: i32) -> (i32, i32) {
    %c0_i32 = arith.constant 0 : i32
    %c0_i32_0 = arith.constant 0 : i32
    %c0_i32_1 = arith.constant 0 : i32
    return %c0_i32, %c0_i32_0 : i32, i32
  }
  func.func @transform_5(%arg0: i32) -> (i32, i32) {
    %c0_i32 = arith.constant 0 : i32
    %c0_i32_0 = arith.constant 0 : i32
    return %c0_i32, %arg0 : i32, i32
  }
  func.func @transform_6(%arg0: i32) -> (i32, i32) {
    %c0_i32 = arith.constant 0 : i32
    %c0_i32_0 = arith.constant 0 : i32
    return %c0_i32, %arg0 : i32, i32
  }
}

</mosaic_0001>

<bundles_post_ra>
// kernel: module_forward.1
= control target key start
LH: loop header
LB: loop body
LE: loop exit
PB: predicated region body
PF: predicated region fallthrough
CT: control target
= control target key end

     0   :  { %s1927_s21 = smov 0   ;;  %s1929_s22 = smov 0   ;;  %s3203_s0 = inlined_call_operand.vmem [shape: f32[256,256], index: 0, kind: input, shape index: {}]   ;;  %s3204_s1 = inlined_call_operand.vmem [shape: f32[256,256], index: 1, kind: input, shape index: {}]   ;;  %s3205_s2 = inlined_call_operand.vmem [shape: f32[1,256], index: 2, kind: input, shape index: {}]   ;;  %s3206_s3 = inlined_call_operand.vmem [shape: f32[1,256], index: 3, kind: input, shape index: {}]   ;;  %s3207_s4 = inlined_call_operand.vmem [shape: f32[256,1], index: 4, kind: input, shape index: {}]   ;;  %s3208_s5 = inlined_call_operand.vmem [shape: f32[9,256], index: 5, kind: input, shape index: {}]   ;;  %s3209_s6 = inlined_call_operand.vmem [shape: f32[64,256], index: 6, kind: output, shape index: {}]  }
   0x1   :  { %s1931_s23 = smov 0  }
   0x2 LB: > { %s1943_s24 = sadd.s32 4294967295, %s1888_s23   ;;  %s1946_s25 = sadd.s32 1, %s1888_s23   ;;  %s1888_s23 = sphi %s1931_s23, %s3311_s23   ;;  %s1884_s22 = sphi %s1929_s22, %s3310_s22   ;;  %s1880_s21 = sphi %s1927_s21, %s3309_s21  }
   0x3   : > { %s41_s26 = ssub.s32 %s1888_s23, %s1946_s25  ;;  %s44_s27 = sadd.s32 1, %s1884_s22 }
   0x4   : > { %p42_p0 = scmp.eq.s32.totalorder %s41_s26, 0  ;;  %p51_p1 = scmp.ne.s32.totalorder %s1884_s22, %s1880_s21 }
   0x5   : > { %p52_p2 = scmp.eq.s32.totalorder %s1888_s23, 0  ;;  %p180_p3 = scmp.eq.s32.totalorder %s1943_s24, 1 }
   0x6   : > { %s1956_s28 = scalar_select %p42_p0, %s1884_s22, %s44_s27  }
   0x7   : > { %p1958_p4 = por %p52_p2, %p51_p1  ;;  %p1962_p5 = por %p180_p3, %p51_p1 }
   0x8   : > { %p1740_p6 = scmp.ge.s32.totalorder %s1888_s23, 2 }
   0xa   : > { %208 = sbr.rel (%p1740_p6) target bundleno = 44 (0x2c), region = 24 }
  0x11   : > { %211 = sbr.rel (!%p1958_p4) target bundleno = 37 (0x25), region = 28  ;;  %s213_s7 = sand.u32 (%p1958_p4), 1, %s1884_s22  }
  0x12   : > { %s1742_s8 = sshll.u32 (%p1958_p4), %s1888_s23, 3  ;;  %s1741_s9 = sshll.u32 (%p1958_p4), %s213_s7, 8 }
  0x13   : > { %s1974_s12 = scalar_lea.vmem (%p1958_p4), %s3204_s1, %s1742_s8  ;;  %s1979_s13 = scalar_lea.vmem (%p1958_p4), [#allocation2], %s1741_s9 }
  0x14   : > { %v307_v0 = vld [vmem:[%s1974_s12] sm:$0xff] (%p1958_p4)  ;;  %v309_v1 = vld [vmem:[%s1974_s12 + $0x10] sm:$0xff] (%p1958_p4) }
  0x15   : > { %v311_v2 = vld [vmem:[%s1974_s12 + $0x20] sm:$0xff] (%p1958_p4)  ;;  %308 = vst [vmem:[%s1979_s13] sm:$0xff] (%p1958_p4), %v307_v0  ;;  %310 = vst [vmem:[%s1979_s13 + $0x8] sm:$0xff] (%p1958_p4), %v309_v1  ;;  %v313_v3 = vld [vmem:[%s1974_s12 + $0x30] sm:$0xff] (%p1958_p4) }
  0x16   : > { %312 = vst [vmem:[%s1979_s13 + $0x10] sm:$0xff] (%p1958_p4), %v311_v2  ;;  %v315_v4 = vld [vmem:[%s1974_s12 + $0x40] sm:$0xff] (%p1958_p4)  ;;  %v317_v5 = vld [vmem:[%s1974_s12 + $0x50] sm:$0xff] (%p1958_p4)  ;;  %314 = vst [vmem:[%s1979_s13 + $0x18] sm:$0xff] (%p1958_p4), %v313_v3 }
  0x17   : > { %316 = vst [vmem:[%s1979_s13 + $0x20] sm:$0xff] (%p1958_p4), %v315_v4  ;;  %318 = vst [vmem:[%s1979_s13 + $0x28] sm:$0xff] (%p1958_p4), %v317_v5  ;;  %v319_v6 = vld [vmem:[%s1974_s12 + $0x60] sm:$0xff] (%p1958_p4)  ;;  %v321_v7 = vld [vmem:[%s1974_s12 + $0x70] sm:$0xff] (%p1958_p4) }
  0x18   : > { %v323_v8 = vld [vmem:[%s1974_s12 + $0x80] sm:$0xff]  ;;  %320 = vst [vmem:[%s1979_s13 + $0x30] sm:$0xff] %v319_v6  ;;  %322 = vst [vmem:[%s1979_s13 + $0x38] sm:$0xff] %v321_v7  ;;  %v325_v9 = vld [vmem:[%s1974_s12 + $0x90] sm:$0xff] }
  0x19   : > { %324 = vst [vmem:[%s1979_s13 + $0x40] sm:$0xff] %v323_v8  ;;  %v327_v10 = vld [vmem:[%s1974_s12 + $0xa0] sm:$0xff]  ;;  %v329_v11 = vld [vmem:[%s1974_s12 + $0xb0] sm:$0xff]  ;;  %326 = vst [vmem:[%s1979_s13 + $0x48] sm:$0xff] %v325_v9 }
  0x1a   : > { %328 = vst [vmem:[%s1979_s13 + $0x50] sm:$0xff] %v327_v10  ;;  %330 = vst [vmem:[%s1979_s13 + $0x58] sm:$0xff] %v329_v11  ;;  %v331_v12 = vld [vmem:[%s1974_s12 + $0xc0] sm:$0xff]  ;;  %v333_v13 = vld [vmem:[%s1974_s12 + $0xd0] sm:$0xff] }
  0x1b   : > { %v335_v14 = vld [vmem:[%s1974_s12 + $0xe0] sm:$0xff]  ;;  %332 = vst [vmem:[%s1979_s13 + $0x60] sm:$0xff] %v331_v12  ;;  %334 = vst [vmem:[%s1979_s13 + $0x68] sm:$0xff] %v333_v13  ;;  %v337_v15 = vld [vmem:[%s1974_s12 + $0xf0] sm:$0xff] }
  0x1c   : > { %336 = vst [vmem:[%s1979_s13 + $0x70] sm:$0xff] %v335_v14  ;;  %v339_v16 = vld [vmem:[%s1974_s12 + $0x100] sm:$0xff]  ;;  %v341_v17 = vld [vmem:[%s1974_s12 + $0x110] sm:$0xff]  ;;  %338 = vst [vmem:[%s1979_s13 + $0x78] sm:$0xff] %v337_v15 }
  0x1d   : > { %340 = vst [vmem:[%s1979_s13 + $0x80] sm:$0xff] %v339_v16  ;;  %342 = vst [vmem:[%s1979_s13 + $0x88] sm:$0xff] %v341_v17  ;;  %v343_v18 = vld [vmem:[%s1974_s12 + $0x120] sm:$0xff]  ;;  %v345_v19 = vld [vmem:[%s1974_s12 + $0x130] sm:$0xff] }
  0x1e   : > { %v347_v20 = vld [vmem:[%s1974_s12 + $0x140] sm:$0xff]  ;;  %344 = vst [vmem:[%s1979_s13 + $0x90] sm:$0xff] %v343_v18  ;;  %346 = vst [vmem:[%s1979_s13 + $0x98] sm:$0xff] %v345_v19  ;;  %v349_v21 = vld [vmem:[%s1974_s12 + $0x150] sm:$0xff] }
  0x1f   : > { %348 = vst [vmem:[%s1979_s13 + $0xa0] sm:$0xff] %v347_v20  ;;  %v351_v22 = vld [vmem:[%s1974_s12 + $0x160] sm:$0xff]  ;;  %v353_v23 = vld [vmem:[%s1974_s12 + $0x170] sm:$0xff]  ;;  %350 = vst [vmem:[%s1979_s13 + $0xa8] sm:$0xff] %v349_v21 }
  0x20   : > { %352 = vst [vmem:[%s1979_s13 + $0xb0] sm:$0xff] %v351_v22  ;;  %354 = vst [vmem:[%s1979_s13 + $0xb8] sm:$0xff] %v353_v23  ;;  %v355_v24 = vld [vmem:[%s1974_s12 + $0x180] sm:$0xff]  ;;  %v357_v25 = vld [vmem:[%s1974_s12 + $0x190] sm:$0xff] }
  0x21   : > { %v359_v26 = vld [vmem:[%s1974_s12 + $0x1a0] sm:$0xff]  ;;  %356 = vst [vmem:[%s1979_s13 + $0xc0] sm:$0xff] %v355_v24  ;;  %358 = vst [vmem:[%s1979_s13 + $0xc8] sm:$0xff] %v357_v25  ;;  %v361_v27 = vld [vmem:[%s1974_s12 + $0x1b0] sm:$0xff] }
  0x22   : > { %360 = vst [vmem:[%s1979_s13 + $0xd0] sm:$0xff] %v359_v26  ;;  %v363_v28 = vld [vmem:[%s1974_s12 + $0x1c0] sm:$0xff]  ;;  %v365_v29 = vld [vmem:[%s1974_s12 + $0x1d0] sm:$0xff]  ;;  %362 = vst [vmem:[%s1979_s13 + $0xd8] sm:$0xff] %v361_v27 }
  0x23   : > { %364 = vst [vmem:[%s1979_s13 + $0xe0] sm:$0xff] %v363_v28  ;;  %366 = vst [vmem:[%s1979_s13 + $0xe8] sm:$0xff] %v365_v29  ;;  %v367_v30 = vld [vmem:[%s1974_s12 + $0x1e0] sm:$0xff]  ;;  %v369_v31 = vld [vmem:[%s1974_s12 + $0x1f0] sm:$0xff] }
  0x24   : > { %368 = vst [vmem:[%s1979_s13 + $0xf0] sm:$0xff] %v367_v30  ;;  %370 = vst [vmem:[%s1979_s13 + $0xf8] sm:$0xff] %v369_v31 }
  0x25 PF: > { %388 = sbr.rel (!%p1958_p4) target bundleno = 44 (0x2c), region = 74  ;;  %s390_s14 = sand.u32 (%p1958_p4), 1, %s1884_s22  }
  0x26   : > { %s1744_s15 = sshll.u32 (%p1958_p4), %s1888_s23, 3  ;;  %s1743_s16 = sshll.u32 (%p1958_p4), %s390_s14, 4 }
  0x27   : > { %s394_s19 = scalar_lea.vmem (%p1958_p4), %s3208_s5, %s1744_s15  ;;  %s392_s20 = scalar_lea.vmem (%p1958_p4), [#allocation3], %s1743_s16 }
  0x28   : > { %v424_v32 = vld [vmem:[%s394_s19] sm:$0xff] (%p1958_p4)  ;;  %v426_v33 = vld [vmem:[%s394_s19 + $0x10] sm:$0xff] (%p1958_p4) }
  0x29   : > { %425 = vst [vmem:[%s392_s20] sm:$0xff] (%p1958_p4), %v424_v32  ;;  %427 = vst [vmem:[%s392_s20 + $0x8] sm:$0xff] (%p1958_p4), %v426_v33 }
  0x2c PF: > { %p1745_p7 = scmp.ge.s32.totalorder %s1888_s23, 1  ;;  %p432_p8 = scmp.lt.s32.totalorder %s1888_s23, 3 }
  0x2e   : > { %p433_p9 = pnand %p1745_p7, %p432_p8 }
  0x30   : > { %436 = sbr.rel (%p433_p9) target bundleno = 556 (0x22c), region = 112 }
  0x37   : > { %s2052_s26 = sand.u32 1, %s1880_s21   ;;  %v491_v34 = vld [vmem:[%s3203_s0 + $0x8] sm:$0xff]  ;;  %v1890_v35 = vmov 0.0|0.0   ;;  %v1891_v36 = vmov 0   ;;  %v1099_v0 = vld [vmem:[%s3207_s4 + $0x10] sm:$0xff]  ;;  %v1097_v1 = vld [vmem:[%s3207_s4] sm:$0xff] }
  0x38   : > { %1756 = vmatprep.subr.bf16.mxu0 %v1890_v35  ;;  %s1746_s7 = sshll.u32 %s2052_s26, 8  ;;  %1804 = vmatprep.subr.bf16.mxu1 %v1890_v35  ;;  %v523_v51 = vld [vmem:[%s3203_s0 + $0x108] sm:$0xff]  ;;  %v1100_v3 = vld [vmem:[%s3207_s4 + $0x18] sm:$0xff]  ;;  %v1101_v9 = vld [vmem:[%s3207_s4 + $0x20] sm:$0xff]  ;;  %s1747_s18 = sshll.u32 %s2052_s26, 4  ;;  %vm1371_vm0 = vcmask 1046528  }
  0x39   : > { %650 = vmatprep.mubr.f32.mxu0 %v491_v34  ;;  %1863 = vset.pattern.permute.xlu1 %v1891_v36  ;;  %s2060_s23 = scalar_lea.vmem [#allocation2], %s1746_s7  ;;  %v1098_v4 = vld [vmem:[%s3207_s4 + $0x8] sm:$0xff]  ;;  %v1104_v13 = vld [vmem:[%s3207_s4 + $0x38] sm:$0xff]  ;;  %v1103_v14 = vld [vmem:[%s3207_s4 + $0x30] sm:$0xff]  ;;  %p484_p10 = scmp.lt.s32.totalorder %s1943_s24, 1 }
  0x3a   : > { %v554_v37 = vld [vmem:[%s2060_s23] sm:$0xff]  ;;  %v555_v38 = vld [vmem:[%s2060_s23 + $0x8] sm:$0xff]  ;;  %v556_v39 = vld [vmem:[%s2060_s23 + $0x10] sm:$0xff]  ;;  %1862 = vset.pattern.permute.xlu0 %v1891_v36  ;;  %730 = vmatprep.mubr.f32.mxu1 %v523_v51  ;;  %s448_s19 = scalar_lea.vmem [#allocation3], %s1747_s18  ;;  %s1748_s10 = sshll.u32 %s2052_s26, 6 }
  0x3b   : > { %v1757_v40 = vpack.c.bf16 %v555_v38, %v554_v37  ;;  %v557_v41 = vld [vmem:[%s2060_s23 + $0x18] sm:$0xff]  ;;  %v558_v43 = vld [vmem:[%s2060_s23 + $0x20] sm:$0xff]  ;;  %v559_v44 = vld [vmem:[%s2060_s23 + $0x28] sm:$0xff]  ;;  %1141 = vperm.xlu1 %1863, %v1099_v0   ;;  %1131 = vperm.xlu0 %1862, %v1097_v1   ;;  %s2682_s20 = scalar_select %p484_p10, %s1943_s24, 1 }
  0x3c   : > { %v1760_v42 = vpack.c.bf16 %v557_v41, %v556_v39  ;;  %v1763_v45 = vpack.c.bf16 %v559_v44, %v558_v43  ;;  %v560_v46 = vld [vmem:[%s2060_s23 + $0x30] sm:$0xff]  ;;  %v561_v47 = vld [vmem:[%s2060_s23 + $0x38] sm:$0xff]  ;;  %v562_v49 = vld [vmem:[%s2060_s23 + $0x40] sm:$0xff]  ;;  %s483_s26 = scalar_lea.vmem [#allocation4], %s1748_s10 }
  0x3d   : > { %1758 = vmatpush1.bf16.msra.mxu0 %v1757_v40  ;;  %1820 = vmatpush1.bf16.msra.mxu1 %v1757_v40  ;;  %v1766_v48 = vpack.c.bf16 %v561_v47, %v560_v46  ;;  %v563_v50 = vld [vmem:[%s2060_s23 + $0x48] sm:$0xff]  ;;  %v564_v53 = vld [vmem:[%s2060_s23 + $0x50] sm:$0xff]  ;;  %v565_v54 = vld [vmem:[%s2060_s23 + $0x58] sm:$0xff]  ;;  %s486_s7 = scalar_lea.vmem %s3205_s2, %s2682_s20  ;;  %s489_s9 = scalar_lea.vmem %s3206_s3, %s2682_s20 }
  0x3e   : > { %1759 = vmatprep.subr.bf16.mxu0 %v1890_v35  ;;  %1805 = vmatprep.subr.bf16.mxu1 %v1890_v35  ;;  %v1769_v52 = vpack.c.bf16 %v563_v50, %v562_v49  ;;  %v1772_v55 = vpack.c.bf16 %v565_v54, %v564_v53  ;;  %v566_v56 = vld [vmem:[%s2060_s23 + $0x60] sm:$0xff]  ;;  %v567_v57 = vld [vmem:[%s2060_s23 + $0x68] sm:$0xff]  ;;  %v568_v59 = vld [vmem:[%s2060_s23 + $0x70] sm:$0xff] }
  0x3f   : > { %v1775_v58 = vpack.c.bf16 %v567_v57, %v566_v56  ;;  %v569_v60 = vld [vmem:[%s2060_s23 + $0x78] sm:$0xff]  ;;  %v570_v62 = vld [vmem:[%s2060_s23 + $0x80] sm:$0xff]  ;;  %v571_v63 = vld [vmem:[%s2060_s23 + $0x88] sm:$0xff]  ;;  %1146 = vperm.xlu1 %1863, %v1100_v3   ;;  %1136 = vperm.xlu0 %1862, %v1098_v4  }
  0x40   : > { %v1778_v61 = vpack.c.bf16 %v569_v60, %v568_v59  ;;  %v1781_v2 = vpack.c.bf16 %v571_v63, %v570_v62  ;;  %v572_v5 = vld [vmem:[%s2060_s23 + $0x90] sm:$0xff]  ;;  %v573_v6 = vld [vmem:[%s2060_s23 + $0x98] sm:$0xff]  ;;  %v1102_v8 = vld [vmem:[%s3207_s4 + $0x28] sm:$0xff] }
  0x41   : > { %1761 = vmatpush1.bf16.msra.mxu0 %v1760_v42  ;;  %1821 = vmatpush1.bf16.msra.mxu1 %v1760_v42  ;;  %v1784_v7 = vpack.c.bf16 %v573_v6, %v572_v5  ;;  %v574_v10 = vld [vmem:[%s2060_s23 + $0xa0] sm:$0xff]  ;;  %v575_v11 = vld [vmem:[%s2060_s23 + $0xa8] sm:$0xff]  ;;  %v576_v15 = vld [vmem:[%s2060_s23 + $0xb0] sm:$0xff] }
  0x42   : > { %1762 = vmatprep.subr.bf16.mxu0 %v1890_v35  ;;  %1806 = vmatprep.subr.bf16.mxu1 %v1890_v35  ;;  %v1787_v12 = vpack.c.bf16 %v575_v11, %v574_v10  ;;  %v577_v16 = vld [vmem:[%s2060_s23 + $0xb8] sm:$0xff]  ;;  %v1106_v18 = vld [vmem:[%s3207_s4 + $0x48] sm:$0xff]  ;;  %v1105_v19 = vld [vmem:[%s3207_s4 + $0x40] sm:$0xff] }
  0x43   : > { %1156 = vperm.xlu1 %1863, %v1102_v8   ;;  %1151 = vperm.xlu0 %1862, %v1101_v9   ;;  %v1790_v17 = vpack.c.bf16 %v577_v16, %v576_v15  ;;  %v578_v20 = vld [vmem:[%s2060_s23 + $0xc0] sm:$0xff]  ;;  %v579_v21 = vld [vmem:[%s2060_s23 + $0xc8] sm:$0xff]  ;;  %v1108_v23 = vld [vmem:[%s3207_s4 + $0x58] sm:$0xff] }
  0x44   : > { %v1793_v22 = vpack.c.bf16 %v579_v21, %v578_v20  ;;  %v1107_v24 = vld [vmem:[%s3207_s4 + $0x50] sm:$0xff]  ;;  %v581_v26 = vld [vmem:[%s2060_s23 + $0xd8] sm:$0xff]  ;;  %v1110_v28 = vld [vmem:[%s3207_s4 + $0x68] sm:$0xff] }
  0x45   : > { %1764 = vmatpush1.bf16.msra.mxu0 %v1763_v45  ;;  %1822 = vmatpush1.bf16.msra.mxu1 %v1763_v45  ;;  %v580_v25 = vld [vmem:[%s2060_s23 + $0xd0] sm:$0xff]  ;;  %v1109_v29 = vld [vmem:[%s3207_s4 + $0x60] sm:$0xff]  ;;  %v583_v31 = vld [vmem:[%s2060_s23 + $0xe8] sm:$0xff] }
  0x46   : > { %1765 = vmatprep.subr.bf16.mxu0 %v1890_v35  ;;  %1807 = vmatprep.subr.bf16.mxu1 %v1890_v35  ;;  %v1796_v27 = vpack.c.bf16 %v581_v26, %v580_v25  ;;  %v582_v30 = vld [vmem:[%s2060_s23 + $0xe0] sm:$0xff]  ;;  %v1112_v33 = vld [vmem:[%s3207_s4 + $0x78] sm:$0xff]  ;;  %v1111_v34 = vld [vmem:[%s3207_s4 + $0x70] sm:$0xff] }
  0x47   : > { %1166 = vperm.xlu1 %1863, %v1104_v13   ;;  %1161 = vperm.xlu0 %1862, %v1103_v14   ;;  %v1799_v32 = vpack.c.bf16 %v583_v31, %v582_v30  ;;  %v584_v36 = vld [vmem:[%s2060_s23 + $0xf0] sm:$0xff]  ;;  %v585_v37 = vld [vmem:[%s2060_s23 + $0xf8] sm:$0xff]  ;;  %v1114_v39 = vld [vmem:[%s3207_s4 + $0x88] sm:$0xff]  ;;  %s1753_s23 = sshll.u32 (%p1962_p5), %s1943_s24, 3 }
  0x48   : > { %v1802_v38 = vpack.c.bf16 %v585_v37, %v584_v36  ;;  %v1113_v40 = vld [vmem:[%s3207_s4 + $0x80] sm:$0xff]  ;;  %v493_v43 = vld [vmem:[%s3203_s0 + $0x18] sm:$0xff]  ;;  %v1115_v45 = vld [vmem:[%s3207_s4 + $0x90] sm:$0xff]  ;;  %s1584_s13 = scalar_lea.vmem (%p1962_p5), %s3209_s6, %s1753_s23 }
  0x49   : > { %1767 = vmatpush1.bf16.msra.mxu0 %v1766_v48  ;;  %1823 = vmatpush1.bf16.msra.mxu1 %v1766_v48  ;;  %v490_v41 = vld [vmem:[%s3203_s0] sm:$0xff]  ;;  %v1116_v44 = vld [vmem:[%s3207_s4 + $0x98] sm:$0xff]  ;;  %v492_v46 = vld [vmem:[%s3203_s0 + $0x10] sm:$0xff] }
  0x4a   : > { %1768 = vmatprep.subr.bf16.mxu0 %v1890_v35  ;;  %1808 = vmatprep.subr.bf16.mxu1 %v1890_v35  ;;  %v522_v42 = vld [vmem:[%s3203_s0 + $0x100] sm:$0xff]  ;;  %v524_v47 = vld [vmem:[%s3203_s0 + $0x110] sm:$0xff]  ;;  %v495_v48 = vld [vmem:[%s3203_s0 + $0x28] sm:$0xff] }
  0x4b   : > { %1176 = vperm.xlu1 %1863, %v1106_v18   ;;  %1171 = vperm.xlu0 %1862, %v1105_v19   ;;  %v527_v49 = vld [vmem:[%s3203_s0 + $0x128] sm:$0xff]  ;;  %v1117_v51 = vld [vmem:[%s3207_s4 + $0xa0] sm:$0xff]  ;;  %v497_v54 = vld [vmem:[%s3203_s0 + $0x38] sm:$0xff] }
  0x4c   : > { %v1118_v50 = vld [vmem:[%s3207_s4 + $0xa8] sm:$0xff]  ;;  %v526_v53 = vld [vmem:[%s3203_s0 + $0x120] sm:$0xff]  ;;  %v1120_v56 = vld [vmem:[%s3207_s4 + $0xb8] sm:$0xff] }
  0x4d   : > { %1770 = vmatpush1.bf16.msra.mxu0 %v1769_v52  ;;  %1824 = vmatpush1.bf16.msra.mxu1 %v1769_v52  ;;  %v494_v52 = vld [vmem:[%s3203_s0 + $0x20] sm:$0xff]  ;;  %v1119_v57 = vld [vmem:[%s3207_s4 + $0xb0] sm:$0xff]  ;;  %v499_v60 = vld [vmem:[%s3203_s0 + $0x48] sm:$0xff] }
  0x4e   : > { %1771 = vmatprep.subr.bf16.mxu0 %v1890_v35  ;;  %1809 = vmatprep.subr.bf16.mxu1 %v1890_v35  ;;  %v528_v59 = vld [vmem:[%s3203_s0 + $0x130] sm:$0xff]  ;;  %v1122_v62 = vld [vmem:[%s3207_s4 + $0xc8] sm:$0xff]  ;;  %v1121_v63 = vld [vmem:[%s3207_s4 + $0xc0] sm:$0xff] }
  0x4f   : > { %1186 = vperm.xlu1 %1863, %v1108_v23   ;;  %1181 = vperm.xlu0 %1862, %v1107_v24   ;;  %v498_v0 = vld [vmem:[%s3203_s0 + $0x40] sm:$0xff]  ;;  %v533_v3 = vld [vmem:[%s3203_s0 + $0x158] sm:$0xff]  ;;  %v1123_v5 = vld [vmem:[%s3207_s4 + $0xd0] sm:$0xff] }
  0x50   : > { %v530_v1 = vld [vmem:[%s3203_s0 + $0x140] sm:$0xff]  ;;  %v1124_v4 = vld [vmem:[%s3207_s4 + $0xd8] sm:$0xff]  ;;  %v500_v6 = vld [vmem:[%s3203_s0 + $0x50] sm:$0xff] }
  0x51   : > { %1773 = vmatpush1.bf16.msra.mxu0 %v1772_v55  ;;  %1825 = vmatpush1.bf16.msra.mxu1 %v1772_v55  ;;  %v529_v55 = vld [vmem:[%s3203_s0 + $0x138] sm:$0xff]  ;;  %v503_v8 = vld [vmem:[%s3203_s0 + $0x68] sm:$0xff]  ;;  %v1125_v11 = vld [vmem:[%s3207_s4 + $0xe0] sm:$0xff] }
  0x52   : > { %1774 = vmatprep.subr.bf16.mxu0 %v1890_v35  ;;  %1810 = vmatprep.subr.bf16.mxu1 %v1890_v35  ;;  %v535_v9 = vld [vmem:[%s3203_s0 + $0x168] sm:$0xff]  ;;  %v534_v13 = vld [vmem:[%s3203_s0 + $0x160] sm:$0xff]  ;;  %v505_v14 = vld [vmem:[%s3203_s0 + $0x78] sm:$0xff] }
  0x53   : > { %1196 = vperm.xlu1 %1863, %v1110_v28   ;;  %1191 = vperm.xlu0 %1862, %v1109_v29   ;;  %v1126_v10 = vld [vmem:[%s3207_s4 + $0xe8] sm:$0xff]  ;;  %v537_v15 = vld [vmem:[%s3203_s0 + $0x178] sm:$0xff]  ;;  %v504_v18 = vld [vmem:[%s3203_s0 + $0x70] sm:$0xff] }
  0x54   : > { %v1128_v16 = vld [vmem:[%s3207_s4 + $0xf8] sm:$0xff]  ;;  %v536_v19 = vld [vmem:[%s3203_s0 + $0x170] sm:$0xff]  ;;  %v507_v20 = vld [vmem:[%s3203_s0 + $0x88] sm:$0xff] }
  0x55   : > { %1776 = vmatpush1.bf16.msra.mxu0 %v1775_v58  ;;  %1826 = vmatpush1.bf16.msra.mxu1 %v1775_v58  ;;  %v496_v58 = vld [vmem:[%s3203_s0 + $0x30] sm:$0xff]  ;;  %v539_v21 = vld [vmem:[%s3203_s0 + $0x188] sm:$0xff]  ;;  %v538_v23 = vld [vmem:[%s3203_s0 + $0x180] sm:$0xff] }
  0x56   : > { %1777 = vmatprep.subr.bf16.mxu0 %v1890_v35  ;;  %1811 = vmatprep.subr.bf16.mxu1 %v1890_v35  ;;  %v509_v24 = vld [vmem:[%s3203_s0 + $0x98] sm:$0xff]  ;;  %v508_v26 = vld [vmem:[%s3203_s0 + $0x90] sm:$0xff]  ;;  %v511_v28 = vld [vmem:[%s3203_s0 + $0xa8] sm:$0xff] }
  0x57   : > { %1206 = vperm.xlu1 %1863, %v1112_v33   ;;  %1201 = vperm.xlu0 %1862, %v1111_v34   ;;  %v541_v25 = vld [vmem:[%s3203_s0 + $0x198] sm:$0xff]  ;;  %v543_v29 = vld [vmem:[%s3203_s0 + $0x1a8] sm:$0xff]  ;;  %v510_v30 = vld [vmem:[%s3203_s0 + $0xa0] sm:$0xff] }
  0x58   : > { %v542_v31 = vld [vmem:[%s3203_s0 + $0x1a0] sm:$0xff]  ;;  %v545_v33 = vld [vmem:[%s3203_s0 + $0x1b8] sm:$0xff]  ;;  %v512_v34 = vld [vmem:[%s3203_s0 + $0xb0] sm:$0xff] }
  0x59   : > { %1779 = vmatpush1.bf16.msra.mxu0 %v1778_v61  ;;  %1827 = vmatpush1.bf16.msra.mxu1 %v1778_v61  ;;  %v531_v61 = vld [vmem:[%s3203_s0 + $0x148] sm:$0xff]  ;;  %v544_v36 = vld [vmem:[%s3203_s0 + $0x1b0] sm:$0xff] }
  0x5a   : > { %1780 = vmatprep.subr.bf16.mxu0 %v1890_v35  ;;  %1812 = vmatprep.subr.bf16.mxu1 %v1890_v35  ;;  %v515_v37 = vld [vmem:[%s3203_s0 + $0xc8] sm:$0xff] }
  0x5b   : > { %1216 = vperm.xlu1 %1863, %v1114_v39   ;;  %1211 = vperm.xlu0 %1862, %v1113_v40   ;;  %v514_v39 = vld [vmem:[%s3203_s0 + $0xc0] sm:$0xff] }
  0x5c   : > { %v546_v40 = vld [vmem:[%s3203_s0 + $0x1c0] sm:$0xff] }
  0x5d   : > { %1782 = vmatpush1.bf16.msra.mxu0 %v1781_v2  ;;  %1828 = vmatpush1.bf16.msra.mxu1 %v1781_v2  ;;  %v501_v2 = vld [vmem:[%s3203_s0 + $0x58] sm:$0xff] }
  0x5e   : > { %1783 = vmatprep.subr.bf16.mxu0 %v1890_v35  ;;  %1813 = vmatprep.subr.bf16.mxu1 %v1890_v35 }
  0x5f   : > { %1226 = vperm.xlu1 %1863, %v1116_v44   ;;  %1221 = vperm.xlu0 %1862, %v1115_v45   ;;  %v519_v44 = vld [vmem:[%s3203_s0 + $0xe8] sm:$0xff] }
  0x60   : > { %v551_v45 = vld [vmem:[%s3203_s0 + $0x1e8] sm:$0xff] }
  0x61   : > { %1785 = vmatpush1.bf16.msra.mxu0 %v1784_v7  ;;  %1829 = vmatpush1.bf16.msra.mxu1 %v1784_v7  ;;  %v532_v7 = vld [vmem:[%s3203_s0 + $0x150] sm:$0xff] }
  0x62   : > { %1786 = vmatprep.subr.bf16.mxu0 %v1890_v35  ;;  %1814 = vmatprep.subr.bf16.mxu1 %v1890_v35 }
  0x63   : > { %1236 = vperm.xlu1 %1863, %v1118_v50   ;;  %1231 = vperm.xlu0 %1862, %v1117_v51   ;;  %v520_v50 = vld [vmem:[%s3203_s0 + $0xf0] sm:$0xff] }
  0x64   : > { %v552_v51 = vld [vmem:[%s3203_s0 + $0x1f0] sm:$0xff] }
  0x65   : > { %1788 = vmatpush1.bf16.msra.mxu0 %v1787_v12  ;;  %1830 = vmatpush1.bf16.msra.mxu1 %v1787_v12  ;;  %v502_v12 = vld [vmem:[%s3203_s0 + $0x60] sm:$0xff] }
  0x66   : > { %1789 = vmatprep.subr.bf16.mxu0 %v1890_v35  ;;  %1815 = vmatprep.subr.bf16.mxu1 %v1890_v35 }
  0x67   : > { %1246 = vperm.xlu1 %1863, %v1120_v56   ;;  %1241 = vperm.xlu0 %1862, %v1119_v57  }
  0x69   : > { %1791 = vmatpush1.bf16.msra.mxu0 %v1790_v17  ;;  %1831 = vmatpush1.bf16.msra.mxu1 %v1790_v17  ;;  %v1127_v17 = vld [vmem:[%s3207_s4 + $0xf0] sm:$0xff] }
  0x6a   : > { %1792 = vmatprep.subr.bf16.mxu0 %v1890_v35  ;;  %1816 = vmatprep.subr.bf16.mxu1 %v1890_v35 }
  0x6b   : > { %1256 = vperm.xlu1 %1863, %v1122_v62   ;;  %1251 = vperm.xlu0 %1862, %v1121_v63  }
  0x6d   : > { %1794 = vmatpush1.bf16.msra.mxu0 %v1793_v22  ;;  %1832 = vmatpush1.bf16.msra.mxu1 %v1793_v22  ;;  %v506_v22 = vld [vmem:[%s3203_s0 + $0x80] sm:$0xff] }
  0x6e   : > { %1795 = vmatprep.subr.bf16.mxu0 %v1890_v35  ;;  %1817 = vmatprep.subr.bf16.mxu1 %v1890_v35 }
  0x6f   : > { %1266 = vperm.xlu1 %1863, %v1124_v4   ;;  %1261 = vperm.xlu0 %1862, %v1123_v5  }
  0x71   : > { %1797 = vmatpush1.bf16.msra.mxu0 %v1796_v27  ;;  %1833 = vmatpush1.bf16.msra.mxu1 %v1796_v27  ;;  %v540_v27 = vld [vmem:[%s3203_s0 + $0x190] sm:$0xff] }
  0x72   : > { %1798 = vmatprep.subr.bf16.mxu0 %v1890_v35  ;;  %1818 = vmatprep.subr.bf16.mxu1 %v1890_v35 }
  0x73   : > { %1276 = vperm.xlu1 %1863, %v1126_v10   ;;  %1271 = vperm.xlu0 %1862, %v1125_v11  }
  0x75   : > { %1800 = vmatpush1.bf16.msra.mxu0 %v1799_v32  ;;  %1834 = vmatpush1.bf16.msra.mxu1 %v1799_v32  ;;  %v513_v32 = vld [vmem:[%s3203_s0 + $0xb8] sm:$0xff] }
  0x76   : > { %1801 = vmatprep.subr.bf16.mxu0 %v1890_v35  ;;  %1819 = vmatprep.subr.bf16.mxu1 %v1890_v35  ;;  %v525_v35 = vld [vmem:[%s3203_s0 + $0x118] sm:$0xff] }
  0x77   : > { %1286 = vperm.xlu1 %1863, %v1128_v16   ;;  %1281 = vperm.xlu0 %1862, %v1127_v17  }
  0x79   : > { %1803 = vmatpush1.bf16.msra.mxu0 %v1802_v38  ;;  %1835 = vmatpush1.bf16.msra.mxu1 %v1802_v38  ;;  %v547_v38 = vld [vmem:[%s3203_s0 + $0x1c8] sm:$0xff] }
  0x7c   : > { %651 = vmatmul.mubr.f32.vlgmr.msra.gmra.mrb[0].mxu0 %v490_v41  ;;  %731 = vmatmul.mubr.f32.vlgmr.msra.gmra.mrb[0].mxu1 %v522_v42  ;;  %v517_v41 = vld [vmem:[%s3203_s0 + $0xd8] sm:$0xff] }
  0x7d   : > { %655 = vmatprep.mubr.f32.mxu0 %v493_v43  ;;  %735 = vmatprep.mubr.f32.mxu1 %v525_v35  ;;  %v549_v42 = vld [vmem:[%s3203_s0 + $0x1d8] sm:$0xff]  ;;  %v516_v43 = vld [vmem:[%s3203_s0 + $0xd0] sm:$0xff] }
  0x7e   : > { %v548_v35 = vld [vmem:[%s3203_s0 + $0x1d0] sm:$0xff] }
  0x80   : > { %656 = vmatmul.mubr.f32.gmra.mrb[2].mxu0 %v492_v46  ;;  %736 = vmatmul.mubr.f32.gmra.mrb[2].mxu1 %v524_v47  ;;  %v518_v46 = vld [vmem:[%s3203_s0 + $0xe0] sm:$0xff] }
  0x81   : > { %660 = vmatprep.mubr.f32.mxu0 %v495_v48  ;;  %740 = vmatprep.mubr.f32.mxu1 %v527_v49  ;;  %v550_v47 = vld [vmem:[%s3203_s0 + $0x1e0] sm:$0xff]  ;;  %v521_v48 = vld [vmem:[%s3203_s0 + $0xf8] sm:$0xff] }
  0x82   : > { %v553_v49 = vld [vmem:[%s3203_s0 + $0x1f8] sm:$0xff] }
  0x84   : > { %661 = vmatmul.mubr.f32.gmra.mrb[4].mxu0 %v494_v52  ;;  %741 = vmatmul.mubr.f32.gmra.mrb[4].mxu1 %v526_v53 }
  0x85   : > { %665 = vmatprep.mubr.f32.mxu0 %v497_v54  ;;  %745 = vmatprep.mubr.f32.mxu1 %v529_v55 }
  0x88   : > { %666 = vmatmul.mubr.f32.gmra.mrb[6].mxu0 %v496_v58  ;;  %746 = vmatmul.mubr.f32.gmra.mrb[6].mxu1 %v528_v59 }
  0x89   : > { %670 = vmatprep.mubr.f32.mxu0 %v499_v60  ;;  %750 = vmatprep.mubr.f32.mxu1 %v531_v61 }
  0x8c   : > { %671 = vmatmul.mubr.f32.gmra.mrb[8].mxu0 %v498_v0  ;;  %751 = vmatmul.mubr.f32.gmra.mrb[8].mxu1 %v530_v1 }
  0x8d   : > { %675 = vmatprep.mubr.f32.mxu0 %v501_v2  ;;  %755 = vmatprep.mubr.f32.mxu1 %v533_v3 }
  0x90   : > { %676 = vmatmul.mubr.f32.gmra.mrb[10].mxu0 %v500_v6  ;;  %756 = vmatmul.mubr.f32.gmra.mrb[10].mxu1 %v532_v7 }
  0x91   : > { %680 = vmatprep.mubr.f32.mxu0 %v503_v8  ;;  %760 = vmatprep.mubr.f32.mxu1 %v535_v9 }
  0x94   : > { %681 = vmatmul.mubr.f32.gmra.mrb[12].mxu0 %v502_v12  ;;  %761 = vmatmul.mubr.f32.gmra.mrb[12].mxu1 %v534_v13 }
  0x95   : > { %685 = vmatprep.mubr.f32.mxu0 %v505_v14  ;;  %765 = vmatprep.mubr.f32.mxu1 %v537_v15 }
  0x98   : > { %686 = vmatmul.mubr.f32.gmra.mrb[14].mxu0 %v504_v18  ;;  %766 = vmatmul.mubr.f32.gmra.mrb[14].mxu1 %v536_v19 }
  0x99   : > { %690 = vmatprep.mubr.f32.mxu0 %v507_v20  ;;  %770 = vmatprep.mubr.f32.mxu1 %v539_v21 }
  0x9c   : > { %691 = vmatmul.mubr.f32.gmra.mrb[16].mxu0 %v506_v22  ;;  %771 = vmatmul.mubr.f32.gmra.mrb[16].mxu1 %v538_v23 }
  0x9d   : > { %695 = vmatprep.mubr.f32.mxu0 %v509_v24  ;;  %775 = vmatprep.mubr.f32.mxu1 %v541_v25 }
  0xa0   : > { %696 = vmatmul.mubr.f32.gmra.mrb[18].mxu0 %v508_v26  ;;  %776 = vmatmul.mubr.f32.gmra.mrb[18].mxu1 %v540_v27 }
  0xa1   : > { %700 = vmatprep.mubr.f32.mxu0 %v511_v28  ;;  %780 = vmatprep.mubr.f32.mxu1 %v543_v29 }
  0xa4   : > { %701 = vmatmul.mubr.f32.gmra.mrb[20].mxu0 %v510_v30  ;;  %781 = vmatmul.mubr.f32.gmra.mrb[20].mxu1 %v542_v31 }
  0xa5   : > { %705 = vmatprep.mubr.f32.mxu0 %v513_v32  ;;  %785 = vmatprep.mubr.f32.mxu1 %v545_v33 }
  0xa8   : > { %706 = vmatmul.mubr.f32.gmra.mrb[22].mxu0 %v512_v34  ;;  %786 = vmatmul.mubr.f32.gmra.mrb[22].mxu1 %v544_v36 }
  0xa9   : > { %710 = vmatprep.mubr.f32.mxu0 %v515_v37  ;;  %790 = vmatprep.mubr.f32.mxu1 %v547_v38 }
  0xac   : > { %711 = vmatmul.mubr.f32.gmra.mrb[24].mxu0 %v514_v39  ;;  %791 = vmatmul.mubr.f32.gmra.mrb[24].mxu1 %v546_v40 }
  0xad   : > { %715 = vmatprep.mubr.f32.mxu0 %v517_v41  ;;  %795 = vmatprep.mubr.f32.mxu1 %v549_v42 }
  0xb0   : > { %716 = vmatmul.mubr.f32.gmra.mrb[26].mxu0 %v516_v43  ;;  %796 = vmatmul.mubr.f32.gmra.mrb[26].mxu1 %v548_v35 }
  0xb1   : > { %720 = vmatprep.mubr.f32.mxu0 %v519_v44  ;;  %800 = vmatprep.mubr.f32.mxu1 %v551_v45 }
  0xb4   : > { %721 = vmatmul.mubr.f32.gmra.mrb[28].mxu0 %v518_v46  ;;  %801 = vmatmul.mubr.f32.gmra.mrb[28].mxu1 %v550_v47 }
  0xb5   : > { %725 = vmatprep.mubr.f32.mxu0 %v521_v48  ;;  %805 = vmatprep.mubr.f32.mxu1 %v553_v49 }
  0xb8   : > { %726 = vmatmul.mubr.f32.gmra.mrb[30].mxu0 %v520_v50  ;;  %806 = vmatmul.mubr.f32.gmra.mrb[30].mxu1 %v552_v51 }
 0x14f   : > { %v2409_v52 = vpop.f32.mrb[0].mxu0  ;;  %v2411_v53 = vpop.f32.mrb[0].mxu1 }
 0x150   : > { %v654_v54 = vpop.f32.mrb[1].mxu0  ;;  %v734_v55 = vpop.f32.mrb[1].mxu1  ;;  %v848_v58 = vmul.f32 %v2409_v52, %v2409_v52 }
 0x153   : > { %v2413_v56 = vpop.f32.mrb[2].mxu0  ;;  %v2415_v57 = vpop.f32.mrb[2].mxu1 }
 0x154   : > { %v811_v59 = vadd.f32 %v2413_v56, %v2409_v52  ;;  %v849_v60 = vmul.f32 %v2413_v56, %v2413_v56  ;;  %v659_v61 = vpop.f32.mrb[3].mxu0  ;;  %v739_v62 = vpop.f32.mrb[3].mxu1 }
 0x156   : > { %v880_v63 = vadd.f32 %v849_v60, %v848_v58 }
 0x157   : > { %v2423_v0 = vpop.f32.mrb[4].mxu0  ;;  %v2425_v1 = vpop.f32.mrb[4].mxu1 }
 0x158   : > { %v812_v2 = vadd.f32 %v811_v59, %v2423_v0  ;;  %v850_v3 = vmul.f32 %v2423_v0, %v2423_v0  ;;  %v664_v4 = vpop.f32.mrb[5].mxu0  ;;  %v744_v5 = vpop.f32.mrb[5].mxu1 }
 0x15a   : > { %v881_v6 = vadd.f32 %v880_v63, %v850_v3 }
 0x15b   : > { %v2430_v7 = vpop.f32.mrb[6].mxu0  ;;  %v2432_v8 = vpop.f32.mrb[6].mxu1 }
 0x15c   : > { %v813_v9 = vadd.f32 %v812_v2, %v2430_v7  ;;  %v851_v10 = vmul.f32 %v2430_v7, %v2430_v7  ;;  %v669_v11 = vpop.f32.mrb[7].mxu0  ;;  %v749_v12 = vpop.f32.mrb[7].mxu1 }
 0x15e   : > { %v882_v13 = vadd.f32 %v881_v6, %v851_v10 }
 0x15f   : > { %v2437_v14 = vpop.f32.mrb[8].mxu0  ;;  %v2439_v15 = vpop.f32.mrb[8].mxu1 }
 0x160   : > { %v814_v16 = vadd.f32 %v813_v9, %v2437_v14  ;;  %v852_v17 = vmul.f32 %v2437_v14, %v2437_v14  ;;  %v674_v18 = vpop.f32.mrb[9].mxu0  ;;  %v754_v19 = vpop.f32.mrb[9].mxu1 }
 0x162   : > { %v883_v20 = vadd.f32 %v882_v13, %v852_v17 }
 0x163   : > { %v2444_v21 = vpop.f32.mrb[10].mxu0  ;;  %v2446_v22 = vpop.f32.mrb[10].mxu1 }
 0x164   : > { %v815_v23 = vadd.f32 %v814_v16, %v2444_v21  ;;  %v853_v24 = vmul.f32 %v2444_v21, %v2444_v21  ;;  %v679_v25 = vpop.f32.mrb[11].mxu0  ;;  %v759_v26 = vpop.f32.mrb[11].mxu1 }
 0x166   : > { %v884_v27 = vadd.f32 %v883_v20, %v853_v24 }
 0x167   : > { %v2451_v28 = vpop.f32.mrb[12].mxu0  ;;  %v2453_v29 = vpop.f32.mrb[12].mxu1 }
 0x168   : > { %v816_v30 = vadd.f32 %v815_v23, %v2451_v28  ;;  %v854_v31 = vmul.f32 %v2451_v28, %v2451_v28  ;;  %v684_v32 = vpop.f32.mrb[13].mxu0  ;;  %v764_v33 = vpop.f32.mrb[13].mxu1 }
 0x16a   : > { %v885_v34 = vadd.f32 %v884_v27, %v854_v31 }
 0x16b   : > { %v2458_v36 = vpop.f32.mrb[14].mxu0  ;;  %v2460_v37 = vpop.f32.mrb[14].mxu1 }
 0x16c   : > { %v817_v38 = vadd.f32 %v816_v30, %v2458_v36  ;;  %v855_v39 = vmul.f32 %v2458_v36, %v2458_v36  ;;  %v689_v40 = vpop.f32.mrb[15].mxu0  ;;  %v769_v41 = vpop.f32.mrb[15].mxu1 }
 0x16e   : > { %v886_v42 = vadd.f32 %v885_v34, %v855_v39 }
 0x16f   : > { %v2465_v43 = vpop.f32.mrb[16].mxu0  ;;  %v2467_v35 = vpop.f32.mrb[16].mxu1 }
 0x170   : > { %v818_v44 = vadd.f32 %v817_v38, %v2465_v43  ;;  %v856_v45 = vmul.f32 %v2465_v43, %v2465_v43  ;;  %v694_v46 = vpop.f32.mrb[17].mxu0  ;;  %v774_v47 = vpop.f32.mrb[17].mxu1 }
 0x172   : > { %v887_v48 = vadd.f32 %v886_v42, %v856_v45 }
 0x173   : > { %v2472_v49 = vpop.f32.mrb[18].mxu0  ;;  %v2474_v50 = vpop.f32.mrb[18].mxu1 }
 0x174   : > { %v819_v51 = vadd.f32 %v818_v44, %v2472_v49  ;;  %v857_v54 = vmul.f32 %v2472_v49, %v2472_v49  ;;  %v699_v55 = vpop.f32.mrb[19].mxu0  ;;  %v779_v58 = vpop.f32.mrb[19].mxu1 }
 0x175   : > { %v864_v55 = vmul.f32 %v2411_v53, %v2411_v53 }
 0x176   : > { %v888_v59 = vadd.f32 %v887_v48, %v857_v54 }
 0x177   : > { %v2479_v60 = vpop.f32.mrb[20].mxu0  ;;  %v2481_v61 = vpop.f32.mrb[20].mxu1 }
 0x178   : > { %v820_v62 = vadd.f32 %v819_v51, %v2479_v60  ;;  %v858_v63 = vmul.f32 %v2479_v60, %v2479_v60  ;;  %v704_v2 = vpop.f32.mrb[21].mxu0  ;;  %v784_v3 = vpop.f32.mrb[21].mxu1 }
 0x179   : > { %v866_v3 = vmul.f32 %v2425_v1, %v2425_v1 }
 0x17a   : > { %v889_v4 = vadd.f32 %v888_v59, %v858_v63 }
 0x17b   : > { %v2486_v5 = vpop.f32.mrb[22].mxu0  ;;  %v2488_v6 = vpop.f32.mrb[22].mxu1 }
 0x17c   : > { %v821_v9 = vadd.f32 %v820_v62, %v2486_v5  ;;  %v859_v10 = vmul.f32 %v2486_v5, %v2486_v5  ;;  %v709_v11 = vpop.f32.mrb[23].mxu0  ;;  %v789_v12 = vpop.f32.mrb[23].mxu1  ;;  %v865_v62 = vmul.f32 %v2415_v57, %v2415_v57 }
 0x17e   : > { %v890_v13 = vadd.f32 %v889_v4, %v859_v10  ;;  %v867_v10 = vmul.f32 %v2432_v8, %v2432_v8 }
 0x17f   : > { %v2493_v16 = vpop.f32.mrb[24].mxu0  ;;  %v2495_v17 = vpop.f32.mrb[24].mxu1 }
 0x180   : > { %v822_v18 = vadd.f32 %v821_v9, %v2493_v16  ;;  %v860_v19 = vmul.f32 %v2493_v16, %v2493_v16  ;;  %v714_v20 = vpop.f32.mrb[25].mxu0  ;;  %v794_v23 = vpop.f32.mrb[25].mxu1 }
 0x181   : > { %v869_v20 = vmul.f32 %v2446_v22, %v2446_v22 }
 0x182   : > { %v891_v24 = vadd.f32 %v890_v13, %v860_v19  ;;  %v868_v13 = vmul.f32 %v2439_v15, %v2439_v15 }
 0x183   : > { %v2500_v25 = vpop.f32.mrb[26].mxu0  ;;  %v2502_v26 = vpop.f32.mrb[26].mxu1 }
 0x184   : > { %v823_v27 = vadd.f32 %v822_v18, %v2500_v25  ;;  %v861_v30 = vmul.f32 %v2500_v25, %v2500_v25  ;;  %v719_v31 = vpop.f32.mrb[27].mxu0  ;;  %v799_v32 = vpop.f32.mrb[27].mxu1 }
 0x185   : > { %v871_v32 = vmul.f32 %v2460_v37, %v2460_v37 }
 0x186   : > { %v892_v33 = vadd.f32 %v891_v24, %v861_v30 }
 0x187   : > { %v2507_v34 = vpop.f32.mrb[28].mxu0  ;;  %v2509_v38 = vpop.f32.mrb[28].mxu1 }
 0x188   : > { %v824_v39 = vadd.f32 %v823_v27, %v2507_v34  ;;  %v862_v40 = vmul.f32 %v2507_v34, %v2507_v34  ;;  %v724_v41 = vpop.f32.mrb[29].mxu0  ;;  %v804_v42 = vpop.f32.mrb[29].mxu1  ;;  %v870_v27 = vmul.f32 %v2453_v29, %v2453_v29 }
 0x189   : > { %v2547_v41 = vpop.permute.xlu0 %1131 }
 0x18a   : > { %v893_v44 = vadd.f32 %v892_v33, %v862_v40  ;;  %v2545_v40 = vpop.permute.xlu1 %1141 }
 0x18b   : > { %v2514_v45 = vpop.f32.mrb[30].mxu0  ;;  %v2516_v46 = vpop.f32.mrb[30].mxu1 }
 0x18c   : > { %v825_v47 = vadd.f32 %v824_v39, %v2514_v45  ;;  %v863_v48 = vmul.f32 %v2514_v45, %v2514_v45  ;;  %v729_v51 = vpop.f32.mrb[31].mxu0  ;;  %v809_v54 = vpop.f32.mrb[31].mxu1 }
 0x18d   : > { %v873_v54 = vmul.f32 %v2474_v50, %v2474_v50 }
 0x18e   : > { %v826_v58 = vadd.f32 %v825_v47, %v2411_v53  ;;  %v894_v59 = vadd.f32 %v893_v44, %v863_v48  ;;  %v872_v44 = vmul.f32 %v2467_v35, %v2467_v35 }
 0x190   : > { %v827_v63 = vadd.f32 %v826_v58, %v2415_v57  ;;  %v895_v2 = vadd.f32 %v894_v59, %v864_v55  ;;  %v874_v59 = vmul.f32 %v2481_v61, %v2481_v61 }
 0x192   : > { %v828_v4 = vadd.f32 %v827_v63, %v2425_v1  ;;  %v896_v9 = vadd.f32 %v895_v2, %v865_v62  ;;  %v2558_v62 = vpop.permute.xlu1 %1146  ;;  %v2560_v63 = vpop.permute.xlu0 %1136 }
 0x194   : > { %v829_v11 = vadd.f32 %v828_v4, %v2432_v8  ;;  %v897_v12 = vadd.f32 %v896_v9, %v866_v3  ;;  %v875_v4 = vmul.f32 %v2488_v6, %v2488_v6 }
 0x196   : > { %v898_v18 = vadd.f32 %v897_v12, %v867_v10  ;;  %v830_v19 = vadd.f32 %v829_v11, %v2439_v15  ;;  %v876_v11 = vmul.f32 %v2495_v17, %v2495_v17 }
 0x198   : > { %v831_v23 = vadd.f32 %v830_v19, %v2446_v22  ;;  %v899_v24 = vadd.f32 %v898_v18, %v868_v13  ;;  %v877_v18 = vmul.f32 %v2502_v26, %v2502_v26  ;;  %v2571_v19 = vpop.permute.xlu1 %1156 }
 0x19a   : > { %v832_v30 = vadd.f32 %v831_v23, %v2453_v29  ;;  %v900_v31 = vadd.f32 %v899_v24, %v869_v20  ;;  %v2573_v20 = vpop.permute.xlu0 %1151 }
 0x19c   : > { %v833_v33 = vadd.f32 %v832_v30, %v2460_v37  ;;  %v901_v39 = vadd.f32 %v900_v31, %v870_v27  ;;  %v878_v27 = vmul.f32 %v2509_v38, %v2509_v38  ;;  %v879_v30 = vmul.f32 %v2516_v46, %v2516_v46 }
 0x19e   : > { %v834_v42 = vadd.f32 %v833_v33, %v2467_v35  ;;  %v902_v47 = vadd.f32 %v901_v39, %v871_v32 }
 0x1a0   : > { %v903_v48 = vadd.f32 %v902_v47, %v872_v44  ;;  %v835_v51 = vadd.f32 %v834_v42, %v2474_v50  ;;  %v2581_v42 = vpop.permute.xlu1 %1166  ;;  %v2583_v44 = vpop.permute.xlu0 %1161 }
 0x1a2   : > { %v904_v55 = vadd.f32 %v903_v48, %v873_v54  ;;  %v836_v58 = vadd.f32 %v835_v51, %v2481_v61 }
 0x1a4   : > { %v905_v2 = vadd.f32 %v904_v55, %v874_v59  ;;  %v837_v3 = vadd.f32 %v836_v58, %v2488_v6  ;;  %v2585_v59 = vpop.permute.xlu1 %1176 }
 0x1a6   : > { %v906_v9 = vadd.f32 %v905_v2, %v875_v4  ;;  %v838_v10 = vadd.f32 %v837_v3, %v2495_v17  ;;  %v2587_v2 = vpop.permute.xlu0 %1171 }
 0x1a8   : > { %v907_v12 = vadd.f32 %v906_v9, %v876_v11  ;;  %v839_v13 = vadd.f32 %v838_v10, %v2502_v26 }
 0x1aa   : > { %v908_v23 = vadd.f32 %v907_v12, %v877_v18  ;;  %v840_v24 = vadd.f32 %v839_v13, %v2509_v38  ;;  %v2591_v13 = vpop.permute.xlu1 %1186  ;;  %v2593_v18 = vpop.permute.xlu0 %1181 }
 0x1ac   : > { %v909_v31 = vadd.f32 %v908_v23, %v878_v27  ;;  %v841_v32 = vadd.f32 %v840_v24, %v2516_v46  ;;  %v1323_v23 = vlaneseq }
 0x1ae   : > { %v842_v33 = vrot.slane %v841_v32, 4  ;;  %v910_v39 = vadd.f32 %v909_v31, %v879_v30 }
 0x1b0   : > { %v843_v47 = vadd.f32 %v842_v33, %v841_v32  ;;  %v911_v48 = vrot.slane %v910_v39, 4 }
 0x1b2   : > { %v844_v51 = vrot.slane %v843_v47, 2  ;;  %v912_v54 = vadd.f32 %v911_v48, %v910_v39 }
 0x1b4   : > { %v845_v55 = vadd.f32 %v844_v51, %v843_v47  ;;  %v913_v58 = vrot.slane %v912_v54, 2 }
 0x1b6   : > { %v846_v3 = vrot.slane %v845_v55, 1  ;;  %v914_v4 = vadd.f32 %v913_v58, %v912_v54  ;;  %v2631_v58 = vpop.permute.xlu1 %1196  ;;  %v1324_v54 = vshrl.u32 %v1323_v23, 7 }
 0x1b7   : > { %3227 = vst [vmem:[#allocation5_spill] sm:$0xff] %v2631_v58 }
 0x1b8   : > { %v847_v9 = vadd.f32 %v846_v3, %v845_v55  ;;  %v915_v10 = vrot.slane %v914_v4, 1  ;;  %v2633_v3 = vpop.permute.xlu0 %1191  ;;  %v1530_v47 = vsub.s32 7, %v1324_v54  ;;  %v1345_v39 = vsub.s32 1, %v1324_v54 }
 0x1b9   : > { %3228 = vst [vmem:[#allocation6_spill] sm:$0xff] %v2633_v3  ;;  %v1398_v55 = vsub.s32 2, %v1324_v54  ;;  %v1418_v33 = vsub.s32 3, %v1324_v54  ;;  %v1438_v32 = vsub.s32 4, %v1324_v54 }
 0x1ba   : > { %v916_v11 = vadd.f32 %v915_v10, %v914_v4  ;;  %v2589_v12 = vmul.f32 0.0051020407, %v847_v9  ;;  %v1321_v9 = vld [vmem:[%s448_s19] sm:$0xff]  ;;  %v1490_v4 = vsub.s32 5, %v1324_v54 }
 0x1bb   : > { %v2679_v30 = vrot.slane %v1321_v9, %v1530_v47  ;;  %v2688_v58 = vrot.slane %v1321_v9, %v1398_v55  ;;  %v2690_v3 = vrot.slane %v1321_v9, %v1418_v33 }
 0x1bc   : > { %v918_v24 = vmul.f32 0.0051020407, %v916_v11  ;;  %v919_v27 = vmul.f32 %v2589_v12, %v2589_v12  ;;  %v2666_v11 = vpop.permute.xlu1 %1206  ;;  %v2668_v51 = vpop.permute.xlu0 %1201 }
 0x1bd   : > { %3229 = vst [vmem:[#allocation7_spill] sm:$0xff] %v2666_v11  ;;  %3230 = vst [vmem:[#allocation8_spill] sm:$0xff] %v2668_v51  ;;  %v2684_v11 = vld [vmem:[%s448_s19 + $0x8] ss:$0 sm:$0xff]  ;;  %v2686_v51 = vrot.slane %v1321_v9, %v1345_v39  ;;  %v2700_v47 = vmul.f32 0.0, %v2679_v30  ;;  %v3245_v39 = vsub.f32 %v2409_v52, %v2589_v12  ;;  %v3250_v52 = vsub.f32 %v2444_v21, %v2589_v12 }
 0x1be   : > { %v920_v48 = vsub.f32 %v918_v24, %v919_v27  ;;  %v1325_v24 = vsub.s32 0, %v1324_v54  ;;  %v1510_v27 = vsub.s32 6, %v1324_v54  ;;  %3235 = vst [vmem:[#allocation13_spill] sm:$0xff] %v2679_v30  ;;  %3236 = vst [vmem:[#allocation14_spill] sm:$0xff] %v2684_v11  ;;  %v2692_v54 = vrot.slane %v1321_v9, %v1438_v32 }
 0x1bf   : > { %3237 = vst [vmem:[#allocation15_spill] sm:$0xff] %v2686_v51  ;;  %3238 = vst [vmem:[#allocation16_spill] sm:$0xff] %v2688_v58  ;;  %v3246_v32 = vsub.f32 %v2413_v56, %v2589_v12  ;;  %v3251_v56 = vsub.f32 %v2451_v28, %v2589_v12  ;;  %v3256_v28 = vsub.f32 %v2472_v49, %v2589_v12 }
 0x1c0   : > { %v953_v10 = vadd.f32 1e-05, %v920_v48  ;;  %v2671_v48 = vpop.permute.xlu1 %1216  ;;  %v2675_v23 = vrot.slane %v1321_v9, %v1325_v24  ;;  %v2677_v31 = vrot.slane %v1321_v9, %v1510_v27  ;;  %3239 = vst [vmem:[#allocation17_spill] sm:$0xff] %v2690_v3  ;;  %3240 = vst [vmem:[#allocation18_spill] sm:$0xff] %v2692_v54  ;;  %v2694_v24 = vrot.slane %v1321_v9, %v1490_v4 }
 0x1c1   : > { %3231 = vst [vmem:[#allocation9_spill] sm:$0xff] %v2671_v48  ;;  %3243 = vst [vmem:[#allocation21_spill] sm:$0xff] %v2700_v47  ;;  %v3247_v4 = vsub.f32 %v2423_v0, %v2589_v12  ;;  %v3252_v0 = vsub.f32 %v2458_v36, %v2589_v12  ;;  %v3257_v36 = vsub.f32 %v2479_v60, %v2589_v12 }
 0x1c2   : > { %1864 = vrsqrt.f32 %v953_v10  ;;  %v2673_v10 = vpop.permute.xlu0 %1211  ;;  %3233 = vst [vmem:[#allocation11_spill] sm:$0xff] %v2675_v23  ;;  %3234 = vst [vmem:[#allocation12_spill] sm:$0xff] %v2677_v31  ;;  %v2697_v27 = vmul.f32 0.0, %v2677_v31  ;;  %v2703_v23 = vmul.f32 0.0, %v2684_v11  ;;  %v3249_v11 = vsub.f32 %v2437_v14, %v2589_v12  ;;  %v1749_v31 = vld [vmem:[%s486_s7] ss:$0 sm:$0xff] }
 0x1c3   : > { %3232 = vst [vmem:[#allocation10_spill] sm:$0xff] %v2673_v10  ;;  %3241 = vst [vmem:[#allocation19_spill] sm:$0xff] %v2694_v24  ;;  %v3255_v14 = vsub.f32 %v2465_v43, %v2589_v12  ;;  %v3260_v43 = vsub.f32 %v2500_v25, %v2589_v12  ;;  %v3261_v49 = vsub.f32 %v2507_v34, %v2589_v12 }
 0x1c4   : > { %3242 = vst [vmem:[#allocation20_spill] sm:$0xff] %v2697_v27  ;;  %3244 = vst [vmem:[#allocation22_spill] sm:$0xff] %v2703_v23  ;;  %v3248_v27 = vsub.f32 %v2430_v7, %v2589_v12  ;;  %v2729_v47 = vpop.permute.xlu1 %1226  ;;  %v3262_v60 = vsub.f32 %v2514_v45, %v2589_v12  ;;  %v3265_v25 = vsub.f32 %v2425_v1, %v2589_v12 }
 0x1c5   : > { %3253 = vst [vmem:[#allocation23_spill] sm:$0xff] %v2729_v47  ;;  %v3266_v34 = vsub.f32 %v2432_v8, %v2589_v12  ;;  %v3267_v45 = vsub.f32 %v2439_v15, %v2589_v12  ;;  %v3270_v1 = vsub.f32 %v2460_v37, %v2589_v12  ;;  %v3271_v8 = vsub.f32 %v2467_v35, %v2589_v12  ;;  %v1750_v47 = vld [vmem:[%s489_s9] ss:$0 sm:$0xff] }
 0x1c6   : > { %v2731_v7 = vpop.permute.xlu0 %1221  ;;  %v3272_v15 = vsub.f32 %v2474_v50, %v2589_v12  ;;  %v3275_v37 = vsub.f32 %v2495_v17, %v2589_v12  ;;  %v3276_v35 = vsub.f32 %v2502_v26, %v2589_v12  ;;  %v3277_v50 = vsub.f32 %v2509_v38, %v2589_v12 }
 0x1c7   : > { %3254 = vst [vmem:[#allocation24_spill] sm:$0xff] %v2731_v7 }
 0x1c8   : > { %v2809_v54 = vpop.permute.xlu1 %1236 }
 0x1c9   : > { %3279 = vst [vmem:[#allocation25_spill] sm:$0xff] %v2809_v54 }
 0x1cc   : > { %v1865_v48 = vpop.eup %1864  ;;  %v2817_v7 = vpop.permute.xlu1 %1246 }
 0x1cd   : > { %v955_v33 = vmul.f32 %v1865_v48, %v3245_v39  ;;  %v956_v55 = vmul.f32 %v1865_v48, %v3246_v32  ;;  %v957_v9 = vmul.f32 %v1865_v48, %v3247_v4  ;;  %v958_v30 = vmul.f32 %v1865_v48, %v3248_v27 }
 0x1ce   : > { %v959_v23 = vmul.f32 %v1865_v48, %v3249_v11  ;;  %v960_v39 = vmul.f32 %v1865_v48, %v3250_v52  ;;  %v961_v32 = vmul.f32 %v1865_v48, %v3251_v56  ;;  %v962_v4 = vmul.f32 %v1865_v48, %v3252_v0 }
 0x1cf   : > { %v963_v21 = vmul.f32 %v1865_v48, %v3255_v14  ;;  %v964_v11 = vmul.f32 %v1865_v48, %v3256_v28  ;;  %v965_v27 = vmul.f32 %v1865_v48, %v3257_v36  ;;  %v3258_v52 = vsub.f32 %v2486_v5, %v2589_v12 }
 0x1d0   : > { %v3259_v0 = vsub.f32 %v2493_v16, %v2589_v12  ;;  %v968_v14 = vmul.f32 %v1865_v48, %v3260_v43  ;;  %v969_v28 = vmul.f32 %v1865_v48, %v3261_v49  ;;  %v970_v36 = vmul.f32 %v1865_v48, %v3262_v60 }
 0x1d1   : > { %v966_v56 = vmul.f32 %v1865_v48, %v3258_v52  ;;  %v3263_v5 = vsub.f32 %v2411_v53, %v2589_v12  ;;  %v3264_v16 = vsub.f32 %v2415_v57, %v2589_v12  ;;  %v973_v43 = vmul.f32 %v1865_v48, %v3265_v25 }
 0x1d2   : > { %v967_v24 = vmul.f32 %v1865_v48, %v3259_v0  ;;  %v974_v49 = vmul.f32 %v1865_v48, %v3266_v34  ;;  %v975_v60 = vmul.f32 %v1865_v48, %v3267_v45  ;;  %v3268_v53 = vsub.f32 %v2446_v22, %v2589_v12 }
 0x1d3   : > { %v971_v52 = vmul.f32 %v1865_v48, %v3263_v5  ;;  %v972_v0 = vmul.f32 %v1865_v48, %v3264_v16  ;;  %v3269_v57 = vsub.f32 %v2453_v29, %v2589_v12  ;;  %v978_v25 = vmul.f32 %v1865_v48, %v3270_v1 }
 0x1d4   : > { %v976_v5 = vmul.f32 %v1865_v48, %v3268_v53  ;;  %v979_v34 = vmul.f32 %v1865_v48, %v3271_v8  ;;  %v980_v45 = vmul.f32 %v1865_v48, %v3272_v15  ;;  %v3273_v22 = vsub.f32 %v2481_v61, %v2589_v12 }
 0x1d5   : > { %v977_v16 = vmul.f32 %v1865_v48, %v3269_v57  ;;  %v3274_v29 = vsub.f32 %v2488_v6, %v2589_v12  ;;  %v983_v1 = vmul.f32 %v1865_v48, %v3275_v37  ;;  %v984_v8 = vmul.f32 %v1865_v48, %v3276_v35  ;;  %v2811_v6 = vpop.permute.xlu0 %1231 }
 0x1d6   : > { %v981_v53 = vmul.f32 %v1865_v48, %v3273_v22  ;;  %v985_v15 = vmul.f32 %v1865_v48, %v3277_v50  ;;  %v3278_v61 = vsub.f32 %v2516_v46, %v2589_v12  ;;  %3280 = vst [vmem:[#allocation26_spill] sm:$0xff] %v2811_v6  ;;  %v995_v58 = vmul.f32 %v1749_v31, %v956_v55 }
 0x1d7   : > { %v982_v57 = vmul.f32 %v1865_v48, %v3274_v29  ;;  %v994_v29 = vmul.f32 %v1749_v31, %v955_v33  ;;  %v996_v17 = vmul.f32 %v1749_v31, %v957_v9  ;;  %v997_v37 = vmul.f32 %v1749_v31, %v958_v30 }
 0x1d8   : > { %v986_v22 = vmul.f32 %v1865_v48, %v3278_v61  ;;  %v998_v3 = vmul.f32 %v1749_v31, %v959_v23  ;;  %v999_v51 = vmul.f32 %v1749_v31, %v960_v39  ;;  %v1000_v26 = vmul.f32 %v1749_v31, %v961_v32 }
 0x1d9   : > { %v1001_v35 = vmul.f32 %v1749_v31, %v962_v4  ;;  %v1002_v38 = vmul.f32 %v1749_v31, %v963_v21  ;;  %v1003_v50 = vmul.f32 %v1749_v31, %v964_v11  ;;  %v1004_v46 = vmul.f32 %v1749_v31, %v965_v27  ;;  %v2819_v10 = vpop.permute.xlu0 %1241 }
 0x1da   : > { %v1005_v12 = vmul.f32 %v1749_v31, %v966_v56  ;;  %v1006_v48 = vmul.f32 %v1749_v31, %v967_v24  ;;  %v1007_v61 = vmul.f32 %v1749_v31, %v968_v14  ;;  %v1008_v54 = vmul.f32 %v1749_v31, %v969_v28 }
 0x1db   : > { %v1009_v6 = vmul.f32 %v1749_v31, %v970_v36  ;;  %v1010_v33 = vmul.f32 %v1749_v31, %v971_v52  ;;  %v1011_v55 = vmul.f32 %v1749_v31, %v972_v0  ;;  %v1012_v9 = vmul.f32 %v1749_v31, %v973_v43 }
 0x1dc   : > { %v1013_v30 = vmul.f32 %v1749_v31, %v974_v49  ;;  %v1014_v23 = vmul.f32 %v1749_v31, %v975_v60  ;;  %v1015_v39 = vmul.f32 %v1749_v31, %v976_v5  ;;  %v1016_v32 = vmul.f32 %v1749_v31, %v977_v16 }
 0x1dd   : > { %v1017_v4 = vmul.f32 %v1749_v31, %v978_v25  ;;  %v1018_v21 = vmul.f32 %v1749_v31, %v979_v34  ;;  %v1019_v11 = vmul.f32 %v1749_v31, %v980_v45  ;;  %v1020_v27 = vmul.f32 %v1749_v31, %v981_v53 }
 0x1de   : > { %v1021_v24 = vmul.f32 %v1749_v31, %v982_v57  ;;  %v1022_v56 = vmul.f32 %v1749_v31, %v983_v1  ;;  %v1023_v14 = vmul.f32 %v1749_v31, %v984_v8  ;;  %v1024_v28 = vmul.f32 %v1749_v31, %v985_v15  ;;  %v2853_v1 = vpop.permute.xlu1 %1256  ;;  %v2855_v8 = vpop.permute.xlu0 %1251 }
 0x1df   : > { %v1025_v36 = vmul.f32 %v1749_v31, %v986_v22  ;;  %v2821_v52 = vadd.f32 %v1750_v47, %v994_v29  ;;  %v2823_v0 = vadd.f32 %v1750_v47, %v995_v58  ;;  %v2825_v43 = vadd.f32 %v1750_v47, %v996_v17 }
 0x1e0   : > { %v2827_v49 = vadd.f32 %v1750_v47, %v997_v37  ;;  %v2829_v60 = vadd.f32 %v1750_v47, %v998_v3  ;;  %v2831_v5 = vadd.f32 %v1750_v47, %v999_v51  ;;  %v2833_v16 = vadd.f32 %v1750_v47, %v1000_v26 }
 0x1e1   : > { %v2835_v25 = vadd.f32 %v1750_v47, %v1001_v35  ;;  %v2837_v34 = vadd.f32 %v1750_v47, %v1002_v38  ;;  %v2839_v45 = vadd.f32 %v1750_v47, %v1003_v50  ;;  %v2841_v31 = vadd.f32 %v1750_v47, %v1004_v46 }
 0x1e2   : > { %v2843_v58 = vadd.f32 %v1750_v47, %v1005_v12  ;;  %v2845_v53 = vadd.f32 %v1750_v47, %v1006_v48  ;;  %v2847_v57 = vadd.f32 %v1750_v47, %v1007_v61  ;;  %v2849_v3 = vadd.f32 %v1750_v47, %v1008_v54 }
 0x1e3   : > { %v2851_v51 = vadd.f32 %v1750_v47, %v1009_v6  ;;  %v2857_v15 = vadd.f32 %v1750_v47, %v1010_v33  ;;  %v2859_v22 = vadd.f32 %v1750_v47, %v1011_v55  ;;  %v2861_v29 = vadd.f32 %v1750_v47, %v1012_v9 }
 0x1e4   : > { %v2863_v17 = vadd.f32 %v1750_v47, %v1013_v30  ;;  %v2865_v37 = vadd.f32 %v1750_v47, %v1014_v23  ;;  %v2867_v26 = vadd.f32 %v1750_v47, %v1015_v39  ;;  %v2869_v54 = vadd.f32 %v1750_v47, %v1016_v32 }
 0x1e5   : > { %v2871_v6 = vadd.f32 %v1750_v47, %v1017_v4  ;;  %v2873_v35 = vadd.f32 %v1750_v47, %v1018_v21  ;;  %v2875_v38 = vadd.f32 %v1750_v47, %v1019_v11  ;;  %v2877_v50 = vadd.f32 %v1750_v47, %v1020_v27  ;;  %v1267_v11 = vpop.permute.xlu1 %1266  ;;  %v1262_v27 = vpop.permute.xlu0 %1261 }
 0x1e6   : > { %v2879_v46 = vadd.f32 %v1750_v47, %v1021_v24  ;;  %v2881_v12 = vadd.f32 %v1750_v47, %v1022_v56  ;;  %v2883_v48 = vadd.f32 %v1750_v47, %v1023_v14  ;;  %v2885_v61 = vadd.f32 %v1750_v47, %v1024_v28 }
 0x1e7   : > { %v2887_v33 = vadd.f32 %v1750_v47, %v1025_v36  ;;  %v1065_v55 = vmax.f32 %v2821_v52, 0.0  ;;  %v1066_v9 = vmax.f32 %v2823_v0, 0.0  ;;  %v1067_v30 = vmax.f32 %v2825_v43, 0.0 }
 0x1e8   : > { %v1068_v23 = vmax.f32 %v2827_v49, 0.0  ;;  %v1069_v39 = vmax.f32 %v2829_v60, 0.0  ;;  %v1070_v32 = vmax.f32 %v2831_v5, 0.0  ;;  %v1071_v4 = vmax.f32 %v2833_v16, 0.0 }
 0x1e9   : > { %v1072_v21 = vmax.f32 %v2835_v25, 0.0  ;;  %v1073_v47 = vmax.f32 %v2837_v34, 0.0  ;;  %v1074_v24 = vmax.f32 %v2839_v45, 0.0  ;;  %v1075_v56 = vmax.f32 %v2841_v31, 0.0 }
 0x1ea   : > { %v1076_v14 = vmax.f32 %v2843_v58, 0.0  ;;  %v1077_v28 = vmax.f32 %v2845_v53, 0.0  ;;  %v1078_v36 = vmax.f32 %v2847_v57, 0.0  ;;  %v1079_v52 = vmax.f32 %v2849_v3, 0.0 }
 0x1eb   : > { %v1080_v0 = vmax.f32 %v2851_v51, 0.0  ;;  %v1081_v43 = vmax.f32 %v2857_v15, 0.0  ;;  %v1082_v49 = vmax.f32 %v2859_v22, 0.0  ;;  %v1083_v60 = vmax.f32 %v2861_v29, 0.0  ;;  %v1277_v29 = vpop.permute.xlu1 %1276 }
 0x1ec   : > { %v1084_v5 = vmax.f32 %v2863_v17, 0.0  ;;  %v1085_v16 = vmax.f32 %v2865_v37, 0.0  ;;  %v1086_v25 = vmax.f32 %v2867_v26, 0.0  ;;  %v1087_v34 = vmax.f32 %v2869_v54, 0.0  ;;  %v1272_v17 = vpop.permute.xlu0 %1271 }
 0x1ed   : > { %v1088_v45 = vmax.f32 %v2871_v6, 0.0  ;;  %v1089_v31 = vmax.f32 %v2873_v35, 0.0  ;;  %v1090_v58 = vmax.f32 %v2875_v38, 0.0  ;;  %v1091_v53 = vmax.f32 %v2877_v50, 0.0 }
 0x1ee   : > { %v1092_v57 = vmax.f32 %v2879_v46, 0.0  ;;  %v1093_v3 = vmax.f32 %v2881_v12, 0.0  ;;  %v1094_v51 = vmax.f32 %v2883_v48, 0.0  ;;  %v1095_v15 = vmax.f32 %v2885_v61, 0.0  ;;  %v3281_v46 = vld [vmem:[#allocation6_spill] sm:$0xff]  ;;  %v3282_v12 = vld [vmem:[#allocation5_spill] sm:$0xff] }
 0x1ef   : > { %v1096_v22 = vmax.f32 %v2887_v33, 0.0  ;;  %v2922_v37 = vmul.f32 %v2547_v41, %v1065_v55  ;;  %v2925_v26 = vmul.f32 %v2560_v63, %v1066_v9  ;;  %v2928_v54 = vmul.f32 %v2545_v40, %v1067_v30  ;;  %v3283_v48 = vld [vmem:[#allocation8_spill] sm:$0xff]  ;;  %v3284_v61 = vld [vmem:[#allocation7_spill] sm:$0xff] }
 0x1f0   : > { %v2931_v6 = vmul.f32 %v2558_v62, %v1068_v23  ;;  %v2934_v35 = vmul.f32 %v2573_v20, %v1069_v39  ;;  %v2937_v38 = vmul.f32 %v2571_v19, %v1070_v32  ;;  %v2940_v50 = vmul.f32 %v2583_v44, %v1071_v4  ;;  %v3288_v30 = vld [vmem:[#allocation23_spill] sm:$0xff]  ;;  %v3289_v39 = vld [vmem:[#allocation26_spill] sm:$0xff]  ;;  %v3290_v4 = vld [vmem:[#allocation25_spill] sm:$0xff] }
 0x1f1   : > { %v2943_v41 = vmul.f32 %v2581_v42, %v1072_v21  ;;  %v1297_v63 = vmul.f32 %v2587_v2, %v1073_v47  ;;  %v2947_v40 = vmul.f32 %v2585_v59, %v1074_v24  ;;  %v2950_v62 = vmul.f32 %v2593_v18, %v1075_v56  ;;  %v3285_v59 = vld [vmem:[#allocation10_spill] sm:$0xff]  ;;  %v3286_v18 = vld [vmem:[#allocation9_spill] sm:$0xff]  ;;  %v1287_v56 = vpop.permute.xlu1 %1286 }
 0x1f2   : > { %v2953_v20 = vmul.f32 %v2591_v13, %v1076_v14  ;;  %v2956_v19 = vmul.f32 %v3281_v46, %v1077_v28  ;;  %v2959_v44 = vmul.f32 %v3282_v12, %v1078_v36  ;;  %v2962_v42 = vmul.f32 %v3283_v48, %v1079_v52  ;;  %v3287_v13 = vld [vmem:[#allocation24_spill] sm:$0xff]  ;;  %v1282_v14 = vpop.permute.xlu0 %1281 }
 0x1f3   : > { %v2965_v2 = vmul.f32 %v3284_v61, %v1080_v0  ;;  %v2968_v33 = vmul.f32 %v3285_v59, %v1081_v43  ;;  %v2971_v55 = vmul.f32 %v3286_v18, %v1082_v49  ;;  %v2974_v9 = vmul.f32 %v3287_v13, %v1083_v60  ;;  %v3291_v60 = vld [vmem:[#allocation11_spill] sm:$0xff] }
 0x1f4   : > { %v2977_v23 = vmul.f32 %v3288_v30, %v1084_v5  ;;  %v2980_v32 = vmul.f32 %v3289_v39, %v1085_v16  ;;  %v2983_v21 = vmul.f32 %v3290_v4, %v1086_v25  ;;  %v2986_v47 = vmul.f32 %v2819_v10, %v1087_v34 }
 0x1f5   : > { %v2989_v24 = vmul.f32 %v2817_v7, %v1088_v45  ;;  %v2992_v28 = vmul.f32 %v2855_v8, %v1089_v31  ;;  %v2995_v36 = vmul.f32 %v2853_v1, %v1090_v58  ;;  %v2997_v52 = vmul.f32 %v1262_v27, %v1091_v53  ;;  %v3292_v45 = vld [vmem:[#allocation15_spill] sm:$0xff] }
 0x1f6   : > { %v2999_v0 = vmul.f32 %v1267_v11, %v1092_v57  ;;  %v3001_v43 = vmul.f32 %v1272_v17, %v1093_v3  ;;  %v3003_v10 = vmul.f32 %v1277_v29, %v1094_v51  ;;  %v3005_v49 = vmul.f32 %v1282_v14, %v1095_v15 }
 0x1f7   : > { %v3007_v7 = vmul.f32 %v1287_v56, %v1096_v22  ;;  %v1327_v5 = vmul.f32 %v3291_v60, %v2922_v37  ;;  %v1328_v8 = vmul.f32 %v3291_v60, %v2925_v26  ;;  %v1329_v1 = vmul.f32 %v3291_v60, %v2928_v54 }
 0x1f8   : > { %v1330_v11 = vmul.f32 %v3291_v60, %v2931_v6  ;;  %v1331_v27 = vmul.f32 %v3291_v60, %v2934_v35  ;;  %v1332_v16 = vmul.f32 %v3291_v60, %v2937_v38  ;;  %v1333_v25 = vmul.f32 %v3291_v60, %v2940_v50 }
 0x1f9   : > { %v1334_v34 = vmul.f32 %v3291_v60, %v2943_v41  ;;  %v1347_v31 = vmul.f32 %v3292_v45, %v1297_v63  ;;  %v1348_v58 = vmul.f32 %v3292_v45, %v2947_v40  ;;  %v1349_v53 = vmul.f32 %v3292_v45, %v2950_v62 }
 0x1fa   : > { %v1350_v57 = vmul.f32 %v3292_v45, %v2953_v20  ;;  %v1351_v3 = vmul.f32 %v3292_v45, %v2956_v19  ;;  %v1352_v51 = vmul.f32 %v3292_v45, %v2959_v44  ;;  %v1353_v15 = vmul.f32 %v3292_v45, %v2962_v42 }
 0x1fb   : > { %v1354_v22 = vmul.f32 %v3292_v45, %v2965_v2  ;;  %v1355_v29 = vadd.f32 %v1347_v31, %v1327_v5  ;;  %v1356_v17 = vadd.f32 %v1348_v58, %v1328_v8  ;;  %v1357_v63 = vadd.f32 %v1349_v53, %v1329_v1  ;;  %v3293_v1 = vld [vmem:[#allocation17_spill] sm:$0xff]  ;;  %v3297_v31 = vld [vmem:[#allocation16_spill] sm:$0xff] }
 0x1fc   : > { %v1358_v46 = vadd.f32 %v1350_v57, %v1330_v11  ;;  %v1359_v12 = vadd.f32 %v1351_v3, %v1331_v27  ;;  %v1360_v48 = vadd.f32 %v1352_v51, %v1332_v16  ;;  %v1361_v61 = vadd.f32 %v1353_v15, %v1333_v25 }
 0x1fd   : > { %v1362_v59 = vadd.f32 %v1354_v22, %v1334_v34  ;;  %v1372_v18 = vrot.slane %v2922_v37, 1  ;;  %v1373_v13 = vrot.slane %v2925_v26, 1  ;;  %v1375_v30 = vrot.slane %v2928_v54, 1 }
 0x1fe   : > { %v1377_v39 = vrot.slane %v2931_v6, 1  ;;  %v1379_v4 = vrot.slane %v2934_v35, 1  ;;  %v1381_v56 = vrot.slane %v2937_v38, 1  ;;  %v1383_v14 = vrot.slane %v2940_v50, 1 }
 0x1ff   : > { %v1385_v60 = vrot.slane %v2943_v41, 1  ;;  %v1374_v5 = vsel %vm1371_vm0, %v1372_v18, %v1373_v13  ;;  %v3050_v8 = vsel %vm1371_vm0, %v1373_v13, %v1375_v30  ;;  %v1420_v11 = vmul.f32 %v3293_v1, %v2968_v33 }
 0x200   : > { %v3053_v37 = vsel %vm1371_vm0, %v1375_v30, %v1377_v39  ;;  %v3058_v27 = vsel %vm1371_vm0, %v1377_v39, %v1379_v4  ;;  %v3061_v16 = vsel %vm1371_vm0, %v1379_v4, %v1381_v56  ;;  %v3064_v25 = vsel %vm1371_vm0, %v1381_v56, %v1383_v14 }
 0x201   : > { %3294 = vst [vmem:[#allocation6_spill] sm:$0xff] %v3061_v16  ;;  %3295 = vst [vmem:[#allocation5_spill] sm:$0xff] %v3064_v25  ;;  %v3067_v34 = vsel %vm1371_vm0, %v1383_v14, %v1385_v60  ;;  %v3070_v45 = vsel %vm1371_vm0, %v1385_v60, 0.0  ;;  %v1400_v58 = vmul.f32 %v3297_v31, %v1374_v5  ;;  %v1401_v53 = vmul.f32 %v3297_v31, %v3050_v8 }
 0x202   : > { %3296 = vst [vmem:[#allocation8_spill] sm:$0xff] %v3067_v34  ;;  %v1402_v57 = vmul.f32 %v3297_v31, %v3053_v37  ;;  %v1403_v3 = vmul.f32 %v3297_v31, %v3058_v27  ;;  %v1404_v51 = vmul.f32 %v3297_v31, %v3061_v16  ;;  %v1405_v15 = vmul.f32 %v3297_v31, %v3064_v25 }
 0x203   : > { %v1406_v22 = vmul.f32 %v3297_v31, %v3067_v34  ;;  %v1407_v18 = vmul.f32 %v3297_v31, %v3070_v45  ;;  %v1408_v13 = vadd.f32 %v1400_v58, %v1355_v29  ;;  %v1409_v30 = vadd.f32 %v1401_v53, %v1356_v17 }
 0x204   : > { %v1410_v39 = vadd.f32 %v1402_v57, %v1357_v63  ;;  %v1411_v4 = vadd.f32 %v1403_v3, %v1358_v46  ;;  %v1412_v56 = vadd.f32 %v1404_v51, %v1359_v12  ;;  %v1413_v14 = vadd.f32 %v1405_v15, %v1360_v48  ;;  %v3298_v3 = vld [vmem:[#allocation18_spill] sm:$0xff] }
 0x205   : > { %v1414_v60 = vadd.f32 %v1406_v22, %v1361_v61  ;;  %v1415_v5 = vadd.f32 %v1407_v18, %v1362_v59  ;;  %v1421_v16 = vmul.f32 %v3293_v1, %v2971_v55  ;;  %v1422_v25 = vmul.f32 %v3293_v1, %v2974_v9 }
 0x206   : > { %v1423_v34 = vmul.f32 %v3293_v1, %v2977_v23  ;;  %v1424_v31 = vmul.f32 %v3293_v1, %v2980_v32  ;;  %v1425_v29 = vmul.f32 %v3293_v1, %v2983_v21  ;;  %v1426_v17 = vmul.f32 %v3293_v1, %v2986_v47 }
 0x207   : > { %v1427_v63 = vmul.f32 %v3293_v1, %v2989_v24  ;;  %v1428_v46 = vadd.f32 %v1420_v11, %v1408_v13  ;;  %v1429_v12 = vadd.f32 %v1421_v16, %v1409_v30  ;;  %v1430_v48 = vadd.f32 %v1422_v25, %v1410_v39 }
 0x208   : > { %v1431_v61 = vadd.f32 %v1423_v34, %v1411_v4  ;;  %v1432_v59 = vadd.f32 %v1424_v31, %v1412_v56  ;;  %v1433_v58 = vadd.f32 %v1425_v29, %v1413_v14  ;;  %v1434_v53 = vadd.f32 %v1426_v17, %v1414_v60 }
 0x209   : > { %v1435_v57 = vadd.f32 %v1427_v63, %v1415_v5  ;;  %v1440_v51 = vmul.f32 %v3298_v3, %v2992_v28  ;;  %v1441_v15 = vmul.f32 %v3298_v3, %v2995_v36  ;;  %v1442_v22 = vmul.f32 %v3298_v3, %v2997_v52 }
 0x20a   : > { %v1443_v1 = vmul.f32 %v3298_v3, %v2999_v0  ;;  %v1444_v11 = vmul.f32 %v3298_v3, %v3001_v43  ;;  %v1445_v16 = vmul.f32 %v3298_v3, %v3003_v10  ;;  %v1446_v25 = vmul.f32 %v3298_v3, %v3005_v49 }
 0x20b   : > { %v1447_v28 = vmul.f32 %v3298_v3, %v3007_v7  ;;  %v1448_v34 = vadd.f32 %v1440_v51, %v1428_v46  ;;  %v1449_v36 = vadd.f32 %v1441_v15, %v1429_v12  ;;  %v1450_v18 = vadd.f32 %v1442_v22, %v1430_v48 }
 0x20c   : > { %v1451_v13 = vadd.f32 %v1443_v1, %v1431_v61  ;;  %v1452_v52 = vadd.f32 %v1444_v11, %v1432_v59  ;;  %v1453_v30 = vadd.f32 %v1445_v16, %v1433_v58  ;;  %v1454_v39 = vadd.f32 %v1446_v25, %v1434_v53 }
 0x20d   : > { %v1455_v0 = vadd.f32 %v1447_v28, %v1435_v57  ;;  %v1464_v4 = vrot.slane %v2968_v33, 1  ;;  %v1465_v43 = vrot.slane %v2971_v55, 1  ;;  %v1467_v10 = vrot.slane %v2974_v9, 1  ;;  %v3299_v55 = vld [vmem:[#allocation12_spill] sm:$0xff] }
 0x20e   : > { %v1469_v56 = vrot.slane %v2977_v23, 1  ;;  %v1471_v49 = vrot.slane %v2980_v32, 1  ;;  %v1473_v7 = vrot.slane %v2983_v21, 1  ;;  %v1475_v14 = vrot.slane %v2986_v47, 1 }
 0x20f   : > { %v1477_v60 = vrot.slane %v2989_v24, 1  ;;  %v1466_v5 = vsel %vm1371_vm0, %v1464_v4, %v1465_v43  ;;  %v1468_v31 = vsel %vm1371_vm0, %v1465_v43, %v1467_v10  ;;  %v1512_v29 = vmul.f32 %v3299_v55, %v2925_v26  ;;  %v3300_v24 = vld [vmem:[#allocation19_spill] sm:$0xff] }
 0x210   : > { %v1470_v33 = vsel %vm1371_vm0, %v1467_v10, %v1469_v56  ;;  %v1472_v9 = vsel %vm1371_vm0, %v1469_v56, %v1471_v49  ;;  %v1474_v23 = vsel %vm1371_vm0, %v1471_v49, %v1473_v7  ;;  %v1476_v32 = vsel %vm1371_vm0, %v1473_v7, %v1475_v14  ;;  %v3303_v7 = vld [vmem:[#allocation21_spill] sm:$0xff] }
 0x211   : > { %v1478_v21 = vsel %vm1371_vm0, %v1475_v14, %v1477_v60  ;;  %v1487_v47 = vsel %vm1371_vm0, %v1477_v60, 0.0  ;;  %v1492_v17 = vmul.f32 %v3300_v24, %v1466_v5  ;;  %v1493_v63 = vmul.f32 %v3300_v24, %v1468_v31 }
 0x212   : > { %v1494_v46 = vmul.f32 %v3300_v24, %v1470_v33  ;;  %v1495_v12 = vmul.f32 %v3300_v24, %v1472_v9  ;;  %v1496_v26 = vmul.f32 %v3300_v24, %v1474_v23  ;;  %v1497_v48 = vmul.f32 %v3300_v24, %v1476_v32  ;;  %v3306_v9 = vld [vmem:[#allocation5_spill] sm:$0xff]  ;;  %v3307_v32 = vld [vmem:[#allocation8_spill] sm:$0xff] }
 0x213   : > { %v1498_v61 = vmul.f32 %v3300_v24, %v1478_v21  ;;  %v1499_v59 = vmul.f32 %v3300_v24, %v1487_v47  ;;  %v1500_v58 = vadd.f32 %v1492_v17, %v1448_v34  ;;  %v1501_v53 = vadd.f32 %v1493_v63, %v1449_v36  ;;  %v3308_v17 = vld [vmem:[#allocation22_spill] sm:$0xff] }
 0x214   : > { %v1502_v57 = vadd.f32 %v1494_v46, %v1450_v18  ;;  %v1503_v3 = vadd.f32 %v1495_v12, %v1451_v13  ;;  %v1504_v51 = vadd.f32 %v1496_v26, %v1452_v52  ;;  %v1505_v15 = vadd.f32 %v1497_v48, %v1453_v30  ;;  %v3301_v30 = vld [vmem:[#allocation20_spill] sm:$0xff] }
 0x215   : > { %v1506_v22 = vadd.f32 %v1498_v61, %v1454_v39  ;;  %v1507_v1 = vadd.f32 %v1499_v59, %v1455_v0  ;;  %v1513_v11 = vmul.f32 %v3299_v55, %v2928_v54  ;;  %v1514_v16 = vmul.f32 %v3299_v55, %v2931_v6 }
 0x216   : > { %v1515_v25 = vmul.f32 %v3299_v55, %v2934_v35  ;;  %v1516_v28 = vmul.f32 %v3299_v55, %v2937_v38  ;;  %v1517_v34 = vmul.f32 %v3299_v55, %v2940_v50  ;;  %v1518_v36 = vmul.f32 %v3299_v55, %v2943_v41  ;;  %v3302_v35 = vld [vmem:[#allocation13_spill] sm:$0xff] }
 0x217   : > { %v1520_v18 = vadd.f32 %v1512_v29, %v1500_v58  ;;  %v1521_v13 = vadd.f32 %v1513_v11, %v1501_v53  ;;  %v1522_v52 = vadd.f32 %v1514_v16, %v1502_v57  ;;  %v1527_v39 = vadd.f32 %v3301_v30, %v1507_v1  ;;  %v3305_v29 = vld [vmem:[#allocation6_spill] sm:$0xff] }
 0x218   : > { %v1523_v54 = vadd.f32 %v1515_v25, %v1503_v3  ;;  %v1524_v6 = vadd.f32 %v1516_v28, %v1504_v51  ;;  %v1525_v0 = vadd.f32 %v1517_v34, %v1505_v15  ;;  %v1526_v4 = vadd.f32 %v1518_v36, %v1506_v22 }
 0x219   : > { %v1532_v43 = vmul.f32 %v3302_v35, %v2947_v40  ;;  %v1533_v38 = vmul.f32 %v3302_v35, %v2950_v62  ;;  %v1534_v50 = vmul.f32 %v3302_v35, %v2953_v20  ;;  %v1535_v41 = vmul.f32 %v3302_v35, %v2956_v19  ;;  %v3304_v19 = vld [vmem:[#allocation14_spill] sm:$0xff] }
 0x21a   : > { %v1536_v10 = vmul.f32 %v3302_v35, %v2959_v44  ;;  %v1537_v56 = vmul.f32 %v3302_v35, %v2962_v42  ;;  %v1538_v49 = vmul.f32 %v3302_v35, %v2965_v2  ;;  %v1547_v14 = vadd.f32 %v3303_v7, %v1527_v39 }
 0x21b   : > { %v1540_v40 = vadd.f32 %v1532_v43, %v1520_v18  ;;  %v1541_v62 = vadd.f32 %v1533_v38, %v1521_v13  ;;  %v1542_v60 = vadd.f32 %v1534_v50, %v1522_v52  ;;  %v1543_v5 = vadd.f32 %v1535_v41, %v1523_v54 }
 0x21c   : > { %v1544_v20 = vadd.f32 %v1536_v10, %v1524_v6  ;;  %v1545_v31 = vadd.f32 %v1537_v56, %v1525_v0  ;;  %v1546_v33 = vadd.f32 %v1538_v49, %v1526_v4  ;;  %v1552_v55 = vmul.f32 %v3304_v19, %v3050_v8 }
 0x21d   : > { %v1553_v44 = vmul.f32 %v3304_v19, %v3053_v37  ;;  %v1554_v42 = vmul.f32 %v3304_v19, %v3058_v27  ;;  %v1555_v2 = vmul.f32 %v3304_v19, %v3305_v29  ;;  %v1556_v23 = vmul.f32 %v3304_v19, %v3306_v9  ;;  %1582 = sbr.rel (!%p1962_p5) target bundleno = 556 (0x22c), region = 124 }
 0x21e   : > { %v1557_v21 = vmul.f32 %v3304_v19, %v3307_v32  ;;  %v1558_v47 = vmul.f32 %v3304_v19, %v3070_v45  ;;  %v1560_v24 = vadd.f32 %v1552_v55, %v1540_v40  ;;  %v1567_v63 = vadd.f32 %v3308_v17, %v1547_v14 }
 0x21f   : > { %v1561_v8 = vadd.f32 %v1553_v44, %v1541_v62  ;;  %v1562_v37 = vadd.f32 %v1554_v42, %v1542_v60  ;;  %v1563_v46 = vadd.f32 %v1555_v2, %v1543_v5  ;;  %v1564_v12 = vadd.f32 %v1556_v23, %v1544_v20 }
 0x220   : > { %v1565_v27 = vadd.f32 %v1557_v21, %v1545_v31  ;;  %v1566_v26 = vadd.f32 %v1558_v47, %v1546_v33  ;;  %1568 = vst [vmem:[%s483_s26] sm:$0xff] %v1560_v24  ;;  %1575 = vst [vmem:[%s483_s26 + $0x38] sm:$0xff] %v1567_v63 }
 0x221   : > { %1569 = vst [vmem:[%s483_s26 + $0x8] sm:$0xff] %v1561_v8  ;;  %1570 = vst [vmem:[%s483_s26 + $0x10] sm:$0xff] %v1562_v37 }
 0x222   : > { %1571 = vst [vmem:[%s483_s26 + $0x18] sm:$0xff] %v1563_v46  ;;  %1572 = vst [vmem:[%s483_s26 + $0x20] sm:$0xff] %v1564_v12 }
 0x223   : > { %1573 = vst [vmem:[%s483_s26 + $0x28] sm:$0xff] %v1565_v27  ;;  %1574 = vst [vmem:[%s483_s26 + $0x30] sm:$0xff] %v1566_v26 }
 0x227   : > { %v1626_v45 = vld [vmem:[%s483_s26] sm:$0xff]  ;;  %v1640_v3 = vld [vmem:[%s483_s26 + $0x38] sm:$0xff] }
 0x228   : > { %v1628_v48 = vld [vmem:[%s483_s26 + $0x8] sm:$0xff]  ;;  %v1630_v61 = vld [vmem:[%s483_s26 + $0x10] sm:$0xff]  ;;  %1627 = vst [vmem:[%s1584_s13] sm:$0xff] %v1626_v45  ;;  %1641 = vst [vmem:[%s1584_s13 + $0x70] sm:$0xff] %v1640_v3 }
 0x229   : > { %v1632_v59 = vld [vmem:[%s483_s26 + $0x18] sm:$0xff]  ;;  %v1634_v58 = vld [vmem:[%s483_s26 + $0x20] sm:$0xff]  ;;  %1629 = vst [vmem:[%s1584_s13 + $0x10] sm:$0xff] %v1628_v48  ;;  %1631 = vst [vmem:[%s1584_s13 + $0x20] sm:$0xff] %v1630_v61 }
 0x22a   : > { %v1636_v53 = vld [vmem:[%s483_s26 + $0x28] sm:$0xff]  ;;  %1633 = vst [vmem:[%s1584_s13 + $0x30] sm:$0xff] %v1632_v59  ;;  %1635 = vst [vmem:[%s1584_s13 + $0x40] sm:$0xff] %v1634_v58  ;;  %v1638_v57 = vld [vmem:[%s483_s26 + $0x30] sm:$0xff] }
 0x22b   : > { %1637 = vst [vmem:[%s1584_s13 + $0x50] sm:$0xff] %v1636_v53  ;;  %1639 = vst [vmem:[%s1584_s13 + $0x60] sm:$0xff] %v1638_v57 }
 0x22c PF: > { %p13_p11 = scmp.ge.s32.totalorder %s1946_s25, 4   ;;  %s3309_s21 = smov %s1884_s22 }
 0x22d   : > { %s3310_s22 = smov %s1956_s28  ;;  %s3311_s23 = smov %s1946_s25 }
 0x22e   :  { %15 = sbr.rel (!%p13_p11) target bundleno = 2 (0x2), region = 207 }

</bundles_post_ra>
